<compile_context>
chip_gen: v7x
topology: tpu7x:2x2x1
jax: 0.10.0
libtpu: 0.0.40
codegen_flags: <defaults>
</compile_context>

<pallas_src>
import functools

import jax
import jax.numpy as jnp
from jax.experimental import pallas as pl
from jax.experimental.pallas import tpu as pltpu


def _featurize_kernel(col_ref, row_ref, img_ref, out_ref, *, n_fourier):
    # col_ref: (4n, th, 1) f32   row_ref: (4n, 1, w) f32
    # img_ref: (bt, c, th, w)    out_ref: (bt, 4n + c, th, w)
    # One broadcast-multiply builds the Fourier tile (col along lanes, row along
    # sublanes); the rest is bulk stores — the kernel stays strictly HBM/DMA-bound.
    four = (col_ref[...] * row_ref[...]).astype(out_ref.dtype)        # (4n, th, w)
    bt = out_ref.shape[0]
    for bi in range(bt):                                              # tiny static unroll
        out_ref[bi, :n_fourier, :, :] = four
        out_ref[bi, n_fourier:, :, :] = img_ref[bi, :, :, :]


def _round_up(x, m):
    return ((x + m - 1) // m) * m


def _vmem_ceiling_bytes():
    # Leave headroom below the physical capacity (v7x: 64 MiB) for Mosaic's scratch.
    try:
        cap = int(pltpu.get_tpu_info().vmem_capacity_bytes)
    except Exception:
        cap = 64 * 1024 * 1024
    return min(48 * 1024 * 1024, (3 * cap) // 4)


def _pick_tiles(b, c, h, w, n4, itemsize, *, target_elems=8192, max_step_bytes=6 << 20):
    """Choose (rows-per-spatial-tile, batch-elements-per-step)."""
    c_out = n4 + c
    # Rows per tile: th*w ~ target_elems; capped so the lane-padded (th,1) column
    # table (1 lane pads to 128 in VMEM) stays <= ~4 MiB double-buffered.
    th = max(1, target_elems // max(w, 1))
    col_pad_cap = max(8, (4 << 20) // (n4 * 128 * 4 * 2))
    th = min(th, col_pad_cap)
    if th >= h:
        th = h
    else:
        th = max(8, (th // 8) * 8)        # multiple of 8 (or full extent) -> legal block
        if th >= h:
            th = h
    # Batch elements per grid step: amortize per-step overhead, bounded working set.
    per_batch = (c_out + c) * th * w * itemsize
    bt = int(max(1, min(b, max_step_bytes // max(per_batch, 1), 8)))
    return th, bt


def simple_implicit_featurizer(image, n_freqs=20):
    b, c, h, w = image.shape
    dtype = image.dtype
    n2 = 2 * n_freqs
    n4 = 4 * n_freqs
    c_out = n4 + c
    itemsize = jnp.dtype(dtype).itemsize

    # ---- Tiny, batch-invariant separable tables (f32) --------------------------------
    gh = jnp.linspace(-1.0, 1.0, h, dtype=jnp.float32)
    gw = jnp.linspace(-1.0, 1.0, w, dtype=jnp.float32)
    freqs = jnp.exp(jnp.linspace(-2.0, 10.0, n_freqs, dtype=jnp.float32))
    ph_h = freqs[:, None] * gh[None, :]                 # (n_freqs, h)
    ph_w = freqs[:, None] * gw[None, :]                 # (n_freqs, w)
    ones_h = jnp.ones_like(ph_h)
    ones_w = jnp.ones_like(ph_w)

    def interleave(a, bb):
        # rows a0, b0, a1, b1, ...  -> channel 2f = a[f], channel 2f+1 = b[f]
        return jnp.stack([a, bb], axis=1).reshape(n2, a.shape[-1])

    # col[k, i] * row[k, j] == fourier value of output channel k at pixel (i, j).
    col_tab = jnp.concatenate(
        [interleave(jnp.sin(ph_h), ones_h), interleave(jnp.cos(ph_h), ones_h)], axis=0
    ).reshape(n4, h, 1)                                 # (4n, h, 1)
    row_tab = jnp.concatenate(
        [interleave(ones_w, jnp.sin(ph_w)), interleave(ones_w, jnp.cos(ph_w))], axis=0
    ).reshape(n4, 1, w)                                 # (4n, 1, w)

    # ---- Tiling: rows-of-h tiles (ragged tail masked) + multi-batch blocking ----------
    th, bt = _pick_tiles(b, c, h, w, n4, itemsize)
    grid = (pl.cdiv(h, th), pl.cdiv(b, bt))             # spatial outermost, batch innermost

    # VMEM budget (padded footprints, double-buffered), with headroom for v7x (64 MiB).
    th_p = _round_up(th, 8)
    w_p = _round_up(w, 128)
    blk_out = bt * c_out * th_p * w_p * itemsize
    blk_img = bt * c * th_p * w_p * itemsize
    blk_col = n4 * th_p * 128 * 4                       # (th, 1) lane-pads 1 -> 128
    blk_row = n4 * 8 * w_p * 4                          # (1, w) sublane-pads 1 -> 8
    four_tmp = n4 * th_p * w_p * 4                      # in-kernel fourier tile (f32)
    needed = 2 * (blk_out + blk_img + blk_col + blk_row) + four_tmp
    vmem_limit = int(min(_vmem_ceiling_bytes(), max(16 * 1024 * 1024, 2 * needed)))

    kernel = functools.partial(_featurize_kernel, n_fourier=n4)
    out = pl.pallas_call(
        kernel,
        out_shape=jax.ShapeDtypeStruct((b, c_out, h, w), dtype),
        grid=grid,
        in_specs=[
            pl.BlockSpec((n4, th, 1), lambda j, i: (0, j, 0)),        # per-row table
            pl.BlockSpec((n4, 1, w), lambda j, i: (0, 0, 0)),         # per-column table
            pl.BlockSpec((bt, c, th, w), lambda j, i: (i, 0, j, 0)),  # image tile
        ],
        out_specs=pl.BlockSpec((bt, c_out, th, w), lambda j, i: (i, 0, j, 0)),
        compiler_params=pltpu.CompilerParams(
            dimension_semantics=("parallel", "arbitrary"),
            vmem_limit_bytes=vmem_limit,
        ),
    )(col_tab, row_tab, image)

    return out


def reference_featurizer(image, n_freqs=20):
    # Pure-JAX reference mirroring the PyTorch forward exactly (full-plane sin/cos).
    b, c, h, w = image.shape
    gh = jnp.linspace(-1.0, 1.0, h)
    gw = jnp.linspace(-1.0, 1.0, w)
    GH, GW = jnp.meshgrid(gh, gw, indexing="ij")
    feats = jnp.stack([GH, GW], axis=0)[None]                  # (1, 2, h, w)
    feats = jnp.broadcast_to(feats, (b, 2, h, w))[:, None]     # (b, 1, 2, h, w)
    freqs = jnp.exp(jnp.linspace(-2.0, 10.0, n_freqs)).reshape(1, n_freqs, 1, 1, 1)
    feats = (feats * freqs).reshape(b, n_freqs * 2, h, w)
    return jnp.concatenate(
        [jnp.sin(feats), jnp.cos(feats), image], axis=1
    ).astype(image.dtype)


if __name__ == "__main__":
    n_freqs = 20
    b, c, h, w = 2, 4, 16, 16

    key = jax.random.PRNGKey(0)
    x = jax.random.normal(key, (b, c, h, w), dtype=jnp.float32)

    out = jax.block_until_ready(simple_implicit_featurizer(x, n_freqs=n_freqs))
    ref = reference_featurizer(x, n_freqs=n_freqs)

    assert out.shape == (b, 4 * n_freqs + c, h, w), out.shape
    # Loose tolerance only because the highest frequency ~exp(10) makes f32 sin/cos
    # argument reduction at |arg| ~ 2.2e4 implementation-sensitive (inherent to the op).
    max_diff = float(jnp.max(jnp.abs(out - ref)))
    assert max_diff < 5e-2, f"max diff too large: {max_diff}"
    # Image passthrough channels must match exactly.
    assert bool(jnp.all(out[:, 4 * n_freqs:] == x))

    print("KERNEL_OK")
</pallas_src>

<mosaic_0001>
module attributes {stable_mosaic.version = 11 : i64} {
  func.func @_featurize_kernel(%arg0: i32, %arg1: i32, %arg2: memref<80x16x1xf32, #tpu.memory_space<vmem>>, %arg3: memref<80x1x16xf32, #tpu.memory_space<vmem>>, %arg4: memref<2x4x16x16xf32, #tpu.memory_space<vmem>>, %arg5: memref<2x84x16x16xf32, #tpu.memory_space<vmem>>) attributes {dimension_semantics = [#tpu.dimension_semantics<parallel>, #tpu.dimension_semantics<arbitrary>], iteration_bounds = array<i64: 1, 1>, scalar_prefetch = 0 : i64, scratch_operands = 0 : i64, tpu.core_type = #tpu.core_type<tc>, window_params = [{transform_indices = @transform_0, window_bounds = array<i64: 80, 16, 1>}, {pipeline_mode = #tpu.pipeline_mode<synchronous>, transform_indices = @transform_1, window_bounds = array<i64: 80, 1, 16>}, {transform_indices = @transform_2, window_bounds = array<i64: 2, 4, 16, 16>}, {transform_indices = @transform_3, window_bounds = array<i64: 2, 84, 16, 16>}]} {
    %c0 = arith.constant 0 : index
    %c0_0 = arith.constant 0 : index
    %c0_1 = arith.constant 0 : index
    %0 = vector.load %arg2[%c0, %c0_0, %c0_1] : memref<80x16x1xf32, #tpu.memory_space<vmem>>, vector<80x16x1xf32>
    %c0_2 = arith.constant 0 : index
    %c0_3 = arith.constant 0 : index
    %c0_4 = arith.constant 0 : index
    %1 = vector.load %arg3[%c0_2, %c0_3, %c0_4] : memref<80x1x16xf32, #tpu.memory_space<vmem>>, vector<80x1x16xf32>
    %2 = vector.broadcast %0 : vector<80x16x1xf32> to vector<80x16x16xf32>
    %3 = vector.broadcast %1 : vector<80x1x16xf32> to vector<80x16x16xf32>
    %4 = arith.mulf %2, %3 : vector<80x16x16xf32>
    %c0_5 = arith.constant 0 : index
    %c0_6 = arith.constant 0 : index
    %c0_7 = arith.constant 0 : index
    %c0_8 = arith.constant 0 : index
    %5 = vector.load %arg5[%c0_5, %c0_6, %c0_7, %c0_8] : memref<2x84x16x16xf32, #tpu.memory_space<vmem>>, vector<1x80x16x16xf32>
    %6 = vector.shape_cast %5 : vector<1x80x16x16xf32> to vector<80x16x16xf32>
    %7 = vector.shape_cast %4 : vector<80x16x16xf32> to vector<1x80x16x16xf32>
    tpu.vector_store %arg5[%c0_5, %c0_6, %c0_7, %c0_8], %7 {strides = array<i32>} : memref<2x84x16x16xf32, #tpu.memory_space<vmem>>, vector<1x80x16x16xf32>,
    %c0_9 = arith.constant 0 : index
    %c0_10 = arith.constant 0 : index
    %c0_11 = arith.constant 0 : index
    %c0_12 = arith.constant 0 : index
    %8 = vector.load %arg4[%c0_9, %c0_10, %c0_11, %c0_12] : memref<2x4x16x16xf32, #tpu.memory_space<vmem>>, vector<1x4x16x16xf32>
    %9 = vector.shape_cast %8 : vector<1x4x16x16xf32> to vector<4x16x16xf32>
    %c0_13 = arith.constant 0 : index
    %c80 = arith.constant 80 : index
    %c0_14 = arith.constant 0 : index
    %c0_15 = arith.constant 0 : index
    %10 = vector.load %arg5[%c0_13, %c80, %c0_14, %c0_15] : memref<2x84x16x16xf32, #tpu.memory_space<vmem>>, vector<1x4x16x16xf32>
    %11 = vector.shape_cast %10 : vector<1x4x16x16xf32> to vector<4x16x16xf32>
    %12 = vector.shape_cast %9 : vector<4x16x16xf32> to vector<1x4x16x16xf32>
    tpu.vector_store %arg5[%c0_13, %c80, %c0_14, %c0_15], %12 {strides = array<i32>} : memref<2x84x16x16xf32, #tpu.memory_space<vmem>>, vector<1x4x16x16xf32>,
    %c1 = arith.constant 1 : index
    %c0_16 = arith.constant 0 : index
    %c0_17 = arith.constant 0 : index
    %c0_18 = arith.constant 0 : index
    %13 = vector.load %arg5[%c1, %c0_16, %c0_17, %c0_18] : memref<2x84x16x16xf32, #tpu.memory_space<vmem>>, vector<1x80x16x16xf32>
    %14 = vector.shape_cast %13 : vector<1x80x16x16xf32> to vector<80x16x16xf32>
    %15 = vector.shape_cast %4 : vector<80x16x16xf32> to vector<1x80x16x16xf32>
    tpu.vector_store %arg5[%c1, %c0_16, %c0_17, %c0_18], %15 {strides = array<i32>} : memref<2x84x16x16xf32, #tpu.memory_space<vmem>>, vector<1x80x16x16xf32>,
    %c1_19 = arith.constant 1 : index
    %c0_20 = arith.constant 0 : index
    %c0_21 = arith.constant 0 : index
    %c0_22 = arith.constant 0 : index
    %16 = vector.load %arg4[%c1_19, %c0_20, %c0_21, %c0_22] : memref<2x4x16x16xf32, #tpu.memory_space<vmem>>, vector<1x4x16x16xf32>
    %17 = vector.shape_cast %16 : vector<1x4x16x16xf32> to vector<4x16x16xf32>
    %c1_23 = arith.constant 1 : index
    %c80_24 = arith.constant 80 : index
    %c0_25 = arith.constant 0 : index
    %c0_26 = arith.constant 0 : index
    %18 = vector.load %arg5[%c1_23, %c80_24, %c0_25, %c0_26] : memref<2x84x16x16xf32, #tpu.memory_space<vmem>>, vector<1x4x16x16xf32>
    %19 = vector.shape_cast %18 : vector<1x4x16x16xf32> to vector<4x16x16xf32>
    %20 = vector.shape_cast %17 : vector<4x16x16xf32> to vector<1x4x16x16xf32>
    tpu.vector_store %arg5[%c1_23, %c80_24, %c0_25, %c0_26], %20 {strides = array<i32>} : memref<2x84x16x16xf32, #tpu.memory_space<vmem>>, vector<1x4x16x16xf32>,
    return
  }
  func.func @transform_0(%arg0: i32, %arg1: i32) -> (i32, i32, i32) {
    %c0_i32 = arith.constant 0 : i32
    %c0_i32_0 = arith.constant 0 : i32
    %c0_i32_1 = arith.constant 0 : i32
    return %c0_i32, %arg0, %c0_i32_0 : i32, i32, i32
  }
  func.func @transform_1(%arg0: i32, %arg1: i32) -> (i32, i32, i32) {
    %c0_i32 = arith.constant 0 : i32
    %c0_i32_0 = arith.constant 0 : i32
    %c0_i32_1 = arith.constant 0 : i32
    %c0_i32_2 = arith.constant 0 : i32
    return %c0_i32, %c0_i32_0, %c0_i32_1 : i32, i32, i32
  }
  func.func @transform_2(%arg0: i32, %arg1: i32) -> (i32, i32, i32, i32) {
    %c0_i32 = arith.constant 0 : i32
    %c0_i32_0 = arith.constant 0 : i32
    %c0_i32_1 = arith.constant 0 : i32
    return %arg1, %c0_i32, %arg0, %c0_i32_0 : i32, i32, i32, i32
  }
  func.func @transform_3(%arg0: i32, %arg1: i32) -> (i32, i32, i32, i32) {
    %c0_i32 = arith.constant 0 : i32
    %c0_i32_0 = arith.constant 0 : i32
    %c0_i32_1 = arith.constant 0 : i32
    return %arg1, %c0_i32, %arg0, %c0_i32_0 : i32, i32, i32, i32
  }
}

</mosaic_0001>

<bundles_post_ra>
// kernel: tpu_custom_call.1
= control target key start
LH: loop header
LB: loop body
LE: loop exit
PB: predicated region body
PF: predicated region fallthrough
CT: control target
= control target key end

     0   :  { %8 = vsyncpa [#allocation3], 0  ;;  %s2356_s12 = smov [#allocation2]   ;;  %s4456_s0 = inlined_call_operand.vmem [shape: f32[80,16,1], index: 0, kind: input, shape index: {}]   ;;  %s4457_s1 = inlined_call_operand.vmem [shape: f32[80,1,16], index: 1, kind: input, shape index: {}]   ;;  %s4458_s2 = inlined_call_operand.hbm [shape: f32[2,4,16,16], index: 2, kind: input, shape index: {}]   ;;  %s4459_s3 = inlined_call_operand.vmem [shape: f32[2,84,16,16], index: 3, kind: output, shape index: {}]  }
   0x1   :  { %s18_s13 = sshll.u32 %s2356_s12, 4  ;;  %s2332_s16 = scalar_lea.hbm %s4458_s2, 2048  ;;  %s19_s13 = int_to_ptr.vmem [resolvable:$true] %s18_s13 }
   0x2   :  { %p2333_p0 = scmp.ne.s32.totalorder %s4458_s2, %s2332_s16  ;;  %p2336_p1 = scmp.lt.u32.totalorder %s2332_s16, %s4458_s2 }
   0x4   :  { %p2338_p2 = pnand %p2336_p1, %p2333_p0 }
   0x6   :  { %2341 = shalt.err (!%p2338_p2)
}
   0x7   :  { %s2342_s21 = scalar_lea.vmem %s19_s13, 2048  ;;  %p2347_p4 = scmp.lt.s32.totalorder %s19_s13, %s19_s13 }
   0x8   :  { %p2343_p3 = scmp.ne.s32.totalorder %s19_s13, %s2342_s21  ;;  %p2348_p5 = scmp.lt.s32.totalorder %s2342_s21, %s2342_s21 }
   0xa   :  { %p2349_p6 = por %p2348_p5, %p2347_p4 }
   0xc   :  { %p2350_p7 = pnand %p2349_p6, %p2343_p3 }
   0xe   :  { %2353 = shalt.err (!%p2350_p7)
}
   0xf   :  { %s2357_s22 = smov 128   ;;  %s2358_s23 = smov 8  }
  0x10   :  { %24 = dma.hbm_to_vmem [thread:$0]  %s4458_s2, 2048, %s19_s13, [#allocation3], %s2357_s22, %s2357_s22, %s2358_s23  }
  0x11   :  { %2354 = dma.done.wait [#allocation3], 2048  }
  0x12   :  { %2355 = vsyncadd [#allocation3], 4294965248  ;;  %v2359_v0 = vmov 0   ;;  %vm1708_vm0 = vcmask 130048   ;;  %v1869_v1 = vld [vmem:[#allocation2] sm:$0xff]  ;;  %v1870_v2 = vld [vmem:[#allocation2 + $0x8] sm:$0xff] }
  0x13   :  { %2331 = vset.pattern.permute.xlu1 %v2359_v0  ;;  %2330 = vset.pattern.permute.xlu0 %v2359_v0  ;;  %v1871_v3 = vld [vmem:[#allocation2 + $0x10] sm:$0xff]  ;;  %v1872_v4 = vld [vmem:[#allocation2 + $0x18] sm:$0xff]  ;;  %v1873_v5 = vld [vmem:[#allocation2 + $0x20] sm:$0xff]  ;;  %2150 = vst.msk [vmem:[%s4459_s3 + $0x500] sm:$0xff] %vm1708_vm0, %v1869_v1 }
  0x14   :  { %v1874_v6 = vld [vmem:[#allocation2 + $0x28] sm:$0xff]  ;;  %2151 = vst.msk [vmem:[%s4459_s3 + $0x508] sm:$0xff] %vm1708_vm0, %v1870_v2  ;;  %2152 = vst.msk [vmem:[%s4459_s3 + $0x510] sm:$0xff] %vm1708_vm0, %v1871_v3  ;;  %v1875_v7 = vld [vmem:[#allocation2 + $0x30] sm:$0xff] }
  0x15   :  { %v1876_v8 = vld [vmem:[#allocation2 + $0x38] sm:$0xff]  ;;  %2153 = vst.msk [vmem:[%s4459_s3 + $0x518] sm:$0xff] %vm1708_vm0, %v1872_v4  ;;  %2154 = vst.msk [vmem:[%s4459_s3 + $0x520] sm:$0xff] %vm1708_vm0, %v1873_v5  ;;  %v2048_v9 = vld [vmem:[#allocation2 + $0x40] sm:$0xff] }
  0x16   :  { %2155 = vst.msk [vmem:[%s4459_s3 + $0x528] sm:$0xff] %vm1708_vm0, %v1874_v6  ;;  %2156 = vst.msk [vmem:[%s4459_s3 + $0x530] sm:$0xff] %vm1708_vm0, %v1875_v7  ;;  %v2049_v10 = vld [vmem:[#allocation2 + $0x48] sm:$0xff]  ;;  %v2050_v11 = vld [vmem:[#allocation2 + $0x50] sm:$0xff] }
  0x17   :  { %2157 = vst.msk [vmem:[%s4459_s3 + $0x538] sm:$0xff] %vm1708_vm0, %v1876_v8  ;;  %v2051_v12 = vld [vmem:[#allocation2 + $0x58] sm:$0xff]  ;;  %2318 = vst.msk [vmem:[%s4459_s3 + $0xa40] sm:$0xff] %vm1708_vm0, %v2048_v9  ;;  %v2052_v13 = vld [vmem:[#allocation2 + $0x60] sm:$0xff] }
  0x18   :  { %v2053_v14 = vld [vmem:[#allocation2 + $0x68] sm:$0xff]  ;;  %v2054_v15 = vld [vmem:[#allocation2 + $0x70] sm:$0xff]  ;;  %2319 = vst.msk [vmem:[%s4459_s3 + $0xa48] sm:$0xff] %vm1708_vm0, %v2049_v10  ;;  %2320 = vst.msk [vmem:[%s4459_s3 + $0xa50] sm:$0xff] %vm1708_vm0, %v2050_v11 }
  0x19   :  { %2321 = vst.msk [vmem:[%s4459_s3 + $0xa58] sm:$0xff] %vm1708_vm0, %v2051_v12  ;;  %v2055_v16 = vld [vmem:[#allocation2 + $0x78] sm:$0xff]  ;;  %2322 = vst.msk [vmem:[%s4459_s3 + $0xa60] sm:$0xff] %vm1708_vm0, %v2052_v13  ;;  %v30_v17 = vld [vmem:[%s4456_s0 + $0x10] sm:$0xff] }
  0x1a   :  { %2323 = vst.msk [vmem:[%s4459_s3 + $0xa68] sm:$0xff] %vm1708_vm0, %v2053_v14  ;;  %2324 = vst.msk [vmem:[%s4459_s3 + $0xa70] sm:$0xff] %vm1708_vm0, %v2054_v15  ;;  %v28_v18 = vld [vmem:[%s4456_s0] sm:$0xff]  ;;  %280 = vperm.xlu1 %2331, %v30_v17   ;;  %v31_v19 = vld [vmem:[%s4456_s0 + $0x18] sm:$0xff] }
  0x1b   :  { %2325 = vst.msk [vmem:[%s4459_s3 + $0xa78] sm:$0xff] %vm1708_vm0, %v2055_v16  ;;  %270 = vperm.xlu0 %2330, %v28_v18   ;;  %v29_v20 = vld [vmem:[%s4456_s0 + $0x8] sm:$0xff]  ;;  %v32_v22 = vld [vmem:[%s4456_s0 + $0x20] sm:$0xff]  ;;  %v35_v23 = vld [vmem:[%s4456_s0 + $0x38] sm:$0xff] }
  0x1c   :  { %v33_v21 = vld [vmem:[%s4456_s0 + $0x28] sm:$0xff]  ;;  %v34_v24 = vld [vmem:[%s4456_s0 + $0x30] sm:$0xff]  ;;  %v36_v26 = vld [vmem:[%s4456_s0 + $0x40] sm:$0xff] }
  0x1d   :  { %v37_v25 = vld [vmem:[%s4456_s0 + $0x48] sm:$0xff]  ;;  %v39_v27 = vld [vmem:[%s4456_s0 + $0x58] sm:$0xff]  ;;  %v38_v28 = vld [vmem:[%s4456_s0 + $0x50] sm:$0xff] }
  0x1e   :  { %285 = vperm.xlu1 %2331, %v31_v19   ;;  %v41_v29 = vld [vmem:[%s4456_s0 + $0x68] sm:$0xff]  ;;  %v40_v30 = vld [vmem:[%s4456_s0 + $0x60] sm:$0xff]  ;;  %v43_v31 = vld [vmem:[%s4456_s0 + $0x78] sm:$0xff] }
  0x1f   :  { %275 = vperm.xlu0 %2330, %v29_v20   ;;  %v42_v32 = vld [vmem:[%s4456_s0 + $0x70] sm:$0xff]  ;;  %v45_v33 = vld [vmem:[%s4456_s0 + $0x88] sm:$0xff]  ;;  %v44_v34 = vld [vmem:[%s4456_s0 + $0x80] sm:$0xff] }
  0x20   :  { %v47_v35 = vld [vmem:[%s4456_s0 + $0x98] sm:$0xff]  ;;  %v46_v36 = vld [vmem:[%s4456_s0 + $0x90] sm:$0xff]  ;;  %v49_v37 = vld [vmem:[%s4456_s0 + $0xa8] sm:$0xff] }
  0x21   :  { %v48_v38 = vld [vmem:[%s4456_s0 + $0xa0] sm:$0xff]  ;;  %v51_v39 = vld [vmem:[%s4456_s0 + $0xb8] sm:$0xff]  ;;  %v50_v40 = vld [vmem:[%s4456_s0 + $0xb0] sm:$0xff] }
  0x22   :  { %295 = vperm.xlu1 %2331, %v33_v21   ;;  %v53_v41 = vld [vmem:[%s4456_s0 + $0xc8] sm:$0xff]  ;;  %v52_v42 = vld [vmem:[%s4456_s0 + $0xc0] sm:$0xff]  ;;  %v55_v43 = vld [vmem:[%s4456_s0 + $0xd8] sm:$0xff] }
  0x23   :  { %290 = vperm.xlu0 %2330, %v32_v22   ;;  %v54_v44 = vld [vmem:[%s4456_s0 + $0xd0] sm:$0xff]  ;;  %v57_v45 = vld [vmem:[%s4456_s0 + $0xe8] sm:$0xff]  ;;  %v56_v46 = vld [vmem:[%s4456_s0 + $0xe0] sm:$0xff] }
  0x24   :  { %v59_v47 = vld [vmem:[%s4456_s0 + $0xf8] sm:$0xff]  ;;  %v58_v48 = vld [vmem:[%s4456_s0 + $0xf0] sm:$0xff]  ;;  %v61_v49 = vld [vmem:[%s4456_s0 + $0x108] sm:$0xff] }
  0x25   :  { %v60_v50 = vld [vmem:[%s4456_s0 + $0x100] sm:$0xff]  ;;  %v63_v51 = vld [vmem:[%s4456_s0 + $0x118] sm:$0xff]  ;;  %v62_v52 = vld [vmem:[%s4456_s0 + $0x110] sm:$0xff] }
  0x26   :  { %305 = vperm.xlu1 %2331, %v35_v23   ;;  %v65_v53 = vld [vmem:[%s4456_s0 + $0x128] sm:$0xff]  ;;  %v64_v54 = vld [vmem:[%s4456_s0 + $0x120] sm:$0xff]  ;;  %v67_v55 = vld [vmem:[%s4456_s0 + $0x138] sm:$0xff] }
  0x27   :  { %300 = vperm.xlu0 %2330, %v34_v24   ;;  %v66_v56 = vld [vmem:[%s4456_s0 + $0x130] sm:$0xff]  ;;  %v69_v57 = vld [vmem:[%s4456_s0 + $0x148] sm:$0xff]  ;;  %v68_v58 = vld [vmem:[%s4456_s0 + $0x140] sm:$0xff] }
  0x28   :  { %v71_v59 = vld [vmem:[%s4456_s0 + $0x158] sm:$0xff]  ;;  %v70_v60 = vld [vmem:[%s4456_s0 + $0x150] sm:$0xff]  ;;  %v73_v61 = vld [vmem:[%s4456_s0 + $0x168] sm:$0xff] }
  0x29   :  { %v72_v62 = vld [vmem:[%s4456_s0 + $0x160] sm:$0xff]  ;;  %v75_v63 = vld [vmem:[%s4456_s0 + $0x178] sm:$0xff]  ;;  %v74_v0 = vld [vmem:[%s4456_s0 + $0x170] sm:$0xff] }
  0x2a   :  { %315 = vperm.xlu1 %2331, %v37_v25   ;;  %v77_v1 = vld [vmem:[%s4456_s0 + $0x188] sm:$0xff]  ;;  %v76_v2 = vld [vmem:[%s4456_s0 + $0x180] sm:$0xff]  ;;  %v79_v3 = vld [vmem:[%s4456_s0 + $0x198] sm:$0xff] }
  0x2b   :  { %310 = vperm.xlu0 %2330, %v36_v26   ;;  %v78_v4 = vld [vmem:[%s4456_s0 + $0x190] sm:$0xff]  ;;  %v81_v5 = vld [vmem:[%s4456_s0 + $0x1a8] sm:$0xff]  ;;  %v80_v6 = vld [vmem:[%s4456_s0 + $0x1a0] sm:$0xff] }
  0x2c   :  { %v83_v7 = vld [vmem:[%s4456_s0 + $0x1b8] sm:$0xff]  ;;  %v82_v8 = vld [vmem:[%s4456_s0 + $0x1b0] sm:$0xff]  ;;  %v85_v9 = vld [vmem:[%s4456_s0 + $0x1c8] sm:$0xff] }
  0x2d   :  { %v84_v10 = vld [vmem:[%s4456_s0 + $0x1c0] sm:$0xff]  ;;  %v87_v11 = vld [vmem:[%s4456_s0 + $0x1d8] sm:$0xff]  ;;  %v86_v12 = vld [vmem:[%s4456_s0 + $0x1d0] sm:$0xff] }
  0x2e   :  { %325 = vperm.xlu1 %2331, %v39_v27   ;;  %v89_v13 = vld [vmem:[%s4456_s0 + $0x1e8] sm:$0xff]  ;;  %v88_v14 = vld [vmem:[%s4456_s0 + $0x1e0] sm:$0xff]  ;;  %v91_v15 = vld [vmem:[%s4456_s0 + $0x1f8] sm:$0xff] }
  0x2f   :  { %320 = vperm.xlu0 %2330, %v38_v28   ;;  %v90_v16 = vld [vmem:[%s4456_s0 + $0x1f0] sm:$0xff]  ;;  %v2071_v17 = vld [vmem:[%s4457_s1 + $0x1] ss:$0 sm:$0xff]  ;;  %v2070_v18 = vld [vmem:[%s4457_s1] ss:$0 sm:$0xff] }
  0x30   :  { %v93_v19 = vld [vmem:[%s4456_s0 + $0x208] sm:$0xff]  ;;  %v92_v20 = vld [vmem:[%s4456_s0 + $0x200] sm:$0xff]  ;;  %v95_v25 = vld [vmem:[%s4456_s0 + $0x218] sm:$0xff] }
  0x31   :  { %v94_v26 = vld [vmem:[%s4456_s0 + $0x210] sm:$0xff] }
  0x32   :  { %335 = vperm.xlu1 %2331, %v41_v29  }
  0x33   :  { %330 = vperm.xlu0 %2330, %v40_v30  }
  0x36   :  { %345 = vperm.xlu1 %2331, %v43_v31   ;;  %v2072_v31 = vld [vmem:[%s4457_s1 + $0x2] ss:$0 sm:$0xff] }
  0x37   :  { %340 = vperm.xlu0 %2330, %v42_v32   ;;  %v97_v32 = vld [vmem:[%s4456_s0 + $0x228] sm:$0xff] }
  0x3a   :  { %355 = vperm.xlu1 %2331, %v45_v33   ;;  %v96_v33 = vld [vmem:[%s4456_s0 + $0x220] sm:$0xff] }
  0x3b   :  { %350 = vperm.xlu0 %2330, %v44_v34  }
  0x3e   :  { %365 = vperm.xlu1 %2331, %v47_v35  }
  0x3f   :  { %360 = vperm.xlu0 %2330, %v46_v36  }
  0x42   :  { %375 = vperm.xlu1 %2331, %v49_v37  }
  0x43   :  { %370 = vperm.xlu0 %2330, %v48_v38   ;;  %v2073_v38 = vld [vmem:[%s4457_s1 + $0x3] ss:$0 sm:$0xff] }
  0x46   :  { %385 = vperm.xlu1 %2331, %v51_v39   ;;  %v99_v39 = vld [vmem:[%s4456_s0 + $0x238] sm:$0xff] }
  0x47   :  { %380 = vperm.xlu0 %2330, %v50_v40   ;;  %v98_v40 = vld [vmem:[%s4456_s0 + $0x230] sm:$0xff] }
  0x4a   :  { %395 = vperm.xlu1 %2331, %v53_v41  }
  0x4b   :  { %390 = vperm.xlu0 %2330, %v52_v42  }
  0x4e   :  { %405 = vperm.xlu1 %2331, %v55_v43  }
  0x4f   :  { %400 = vperm.xlu0 %2330, %v54_v44  }
  0x52   :  { %415 = vperm.xlu1 %2331, %v57_v45   ;;  %v2074_v45 = vld [vmem:[%s4457_s1 + $0x4] ss:$0 sm:$0xff] }
  0x53   :  { %410 = vperm.xlu0 %2330, %v56_v46   ;;  %v101_v46 = vld [vmem:[%s4456_s0 + $0x248] sm:$0xff] }
  0x56   :  { %425 = vperm.xlu1 %2331, %v59_v47   ;;  %v100_v47 = vld [vmem:[%s4456_s0 + $0x240] sm:$0xff] }
  0x57   :  { %420 = vperm.xlu0 %2330, %v58_v48  }
  0x5a   :  { %435 = vperm.xlu1 %2331, %v61_v49  }
  0x5b   :  { %430 = vperm.xlu0 %2330, %v60_v50  }
  0x5e   :  { %445 = vperm.xlu1 %2331, %v63_v51  }
  0x5f   :  { %440 = vperm.xlu0 %2330, %v62_v52   ;;  %v2075_v52 = vld [vmem:[%s4457_s1 + $0x5] ss:$0 sm:$0xff] }
  0x62   :  { %455 = vperm.xlu1 %2331, %v65_v53   ;;  %v103_v53 = vld [vmem:[%s4456_s0 + $0x258] sm:$0xff] }
  0x63   :  { %450 = vperm.xlu0 %2330, %v64_v54   ;;  %v102_v54 = vld [vmem:[%s4456_s0 + $0x250] sm:$0xff] }
  0x66   :  { %465 = vperm.xlu1 %2331, %v67_v55  }
  0x67   :  { %460 = vperm.xlu0 %2330, %v66_v56  }
  0x6a   :  { %475 = vperm.xlu1 %2331, %v69_v57  }
  0x6b   :  { %470 = vperm.xlu0 %2330, %v68_v58  }
  0x6e   :  { %485 = vperm.xlu1 %2331, %v71_v59   ;;  %v2076_v59 = vld [vmem:[%s4457_s1 + $0x6] ss:$0 sm:$0xff] }
  0x6f   :  { %480 = vperm.xlu0 %2330, %v70_v60   ;;  %v105_v60 = vld [vmem:[%s4456_s0 + $0x268] sm:$0xff] }
  0x72   :  { %495 = vperm.xlu1 %2331, %v73_v61   ;;  %v104_v61 = vld [vmem:[%s4456_s0 + $0x260] sm:$0xff] }
  0x73   :  { %490 = vperm.xlu0 %2330, %v72_v62  }
  0x76   :  { %505 = vperm.xlu1 %2331, %v75_v63  }
  0x77   :  { %500 = vperm.xlu0 %2330, %v74_v0  }
  0x7a   :  { %515 = vperm.xlu1 %2331, %v77_v1  }
  0x7b   :  { %510 = vperm.xlu0 %2330, %v76_v2   ;;  %v2077_v2 = vld [vmem:[%s4457_s1 + $0x7] ss:$0 sm:$0xff] }
  0x7e   :  { %525 = vperm.xlu1 %2331, %v79_v3   ;;  %v107_v3 = vld [vmem:[%s4456_s0 + $0x278] sm:$0xff] }
  0x7f   :  { %520 = vperm.xlu0 %2330, %v78_v4   ;;  %v106_v4 = vld [vmem:[%s4456_s0 + $0x270] sm:$0xff] }
  0x82   :  { %535 = vperm.xlu1 %2331, %v81_v5  }
  0x83   :  { %530 = vperm.xlu0 %2330, %v80_v6  }
  0x86   :  { %545 = vperm.xlu1 %2331, %v83_v7  }
  0x87   :  { %540 = vperm.xlu0 %2330, %v82_v8  }
  0x8a   :  { %555 = vperm.xlu1 %2331, %v85_v9   ;;  %v2078_v9 = vld [vmem:[%s4457_s1 + $0x8] ss:$0 sm:$0xff] }
  0x8b   :  { %550 = vperm.xlu0 %2330, %v84_v10   ;;  %v109_v10 = vld [vmem:[%s4456_s0 + $0x288] sm:$0xff] }
  0x8e   :  { %565 = vperm.xlu1 %2331, %v87_v11   ;;  %v108_v11 = vld [vmem:[%s4456_s0 + $0x280] sm:$0xff] }
  0x8f   :  { %560 = vperm.xlu0 %2330, %v86_v12  }
  0x92   :  { %575 = vperm.xlu1 %2331, %v89_v13  }
  0x93   :  { %570 = vperm.xlu0 %2330, %v88_v14  }
  0x96   :  { %585 = vperm.xlu1 %2331, %v91_v15  }
  0x97   :  { %580 = vperm.xlu0 %2330, %v90_v16   ;;  %v2079_v16 = vld [vmem:[%s4457_s1 + $0x9] ss:$0 sm:$0xff] }
  0x99   :  { %v281_v21 = vpop.permute.xlu1 %280 }
  0x9a   :  { %v271_v22 = vpop.permute.xlu0 %270  ;;  %v1550_v23 = vmul.f32 %v2071_v17, %v281_v21  ;;  %595 = vperm.xlu1 %2331, %v93_v19  }
  0x9b   :  { %v1548_v24 = vmul.f32 %v2070_v18, %v271_v22  ;;  %590 = vperm.xlu0 %2330, %v92_v20  }
  0x9c   :  { %1711 = vst.msk [vmem:[%s4459_s3 + $0x10] sm:$0xff] %vm1708_vm0, %v1550_v23  ;;  %2160 = vst.msk [vmem:[%s4459_s3 + $0x550] sm:$0xff] %vm1708_vm0, %v1550_v23  ;;  %v2080_v23 = vld [vmem:[%s4457_s1 + $0xa] ss:$0 sm:$0xff] }
  0x9d   :  { %1709 = vst.msk [vmem:[%s4459_s3] sm:$0xff] %vm1708_vm0, %v1548_v24  ;;  %2158 = vst.msk [vmem:[%s4459_s3 + $0x540] sm:$0xff] %vm1708_vm0, %v1548_v24  ;;  %v286_v27 = vpop.permute.xlu1 %285  ;;  %v113_v24 = vld [vmem:[%s4456_s0 + $0x2a8] sm:$0xff] }
  0x9e   :  { %v276_v28 = vpop.permute.xlu0 %275  ;;  %v1551_v29 = vmul.f32 %v2071_v17, %v286_v27  ;;  %605 = vperm.xlu1 %2331, %v95_v25   ;;  %v111_v17 = vld [vmem:[%s4456_s0 + $0x298] sm:$0xff]  ;;  %v112_v25 = vld [vmem:[%s4456_s0 + $0x2a0] sm:$0xff] }
  0x9f   :  { %v1549_v30 = vmul.f32 %v2070_v18, %v276_v28  ;;  %600 = vperm.xlu0 %2330, %v94_v26   ;;  %v110_v18 = vld [vmem:[%s4456_s0 + $0x290] sm:$0xff] }
  0xa0   :  { %1712 = vst.msk [vmem:[%s4459_s3 + $0x18] sm:$0xff] %vm1708_vm0, %v1551_v29  ;;  %2161 = vst.msk [vmem:[%s4459_s3 + $0x558] sm:$0xff] %vm1708_vm0, %v1551_v29 }
  0xa1   :  { %1710 = vst.msk [vmem:[%s4459_s3 + $0x8] sm:$0xff] %vm1708_vm0, %v1549_v30  ;;  %2159 = vst.msk [vmem:[%s4459_s3 + $0x548] sm:$0xff] %vm1708_vm0, %v1549_v30  ;;  %v296_v34 = vpop.permute.xlu1 %295  ;;  %v2081_v30 = vld [vmem:[%s4457_s1 + $0xb] ss:$0 sm:$0xff] }
  0xa2   :  { %v291_v35 = vpop.permute.xlu0 %290  ;;  %v1553_v36 = vmul.f32 %v2072_v31, %v296_v34  ;;  %615 = vperm.xlu1 %2331, %v97_v32   ;;  %v114_v32 = vld [vmem:[%s4456_s0 + $0x2b0] sm:$0xff] }
  0xa3   :  { %v1552_v37 = vmul.f32 %v2072_v31, %v291_v35  ;;  %610 = vperm.xlu0 %2330, %v96_v33   ;;  %v115_v31 = vld [vmem:[%s4456_s0 + $0x2b8] sm:$0xff] }
  0xa4   :  { %1714 = vst.msk [vmem:[%s4459_s3 + $0x28] sm:$0xff] %vm1708_vm0, %v1553_v36  ;;  %2163 = vst.msk [vmem:[%s4459_s3 + $0x568] sm:$0xff] %vm1708_vm0, %v1553_v36 }
  0xa5   :  { %1713 = vst.msk [vmem:[%s4459_s3 + $0x20] sm:$0xff] %vm1708_vm0, %v1552_v37  ;;  %2162 = vst.msk [vmem:[%s4459_s3 + $0x560] sm:$0xff] %vm1708_vm0, %v1552_v37  ;;  %v306_v41 = vpop.permute.xlu1 %305  ;;  %v2082_v37 = vld [vmem:[%s4457_s1 + $0xc] ss:$0 sm:$0xff] }
  0xa6   :  { %v301_v42 = vpop.permute.xlu0 %300  ;;  %v1555_v43 = vmul.f32 %v2073_v38, %v306_v41  ;;  %625 = vperm.xlu1 %2331, %v99_v39   ;;  %v116_v39 = vld [vmem:[%s4456_s0 + $0x2c0] sm:$0xff] }
  0xa7   :  { %v1554_v44 = vmul.f32 %v2073_v38, %v301_v42  ;;  %620 = vperm.xlu0 %2330, %v98_v40   ;;  %v117_v38 = vld [vmem:[%s4456_s0 + $0x2c8] sm:$0xff] }
  0xa8   :  { %1716 = vst.msk [vmem:[%s4459_s3 + $0x38] sm:$0xff] %vm1708_vm0, %v1555_v43  ;;  %2165 = vst.msk [vmem:[%s4459_s3 + $0x578] sm:$0xff] %vm1708_vm0, %v1555_v43 }
  0xa9   :  { %1715 = vst.msk [vmem:[%s4459_s3 + $0x30] sm:$0xff] %vm1708_vm0, %v1554_v44  ;;  %2164 = vst.msk [vmem:[%s4459_s3 + $0x570] sm:$0xff] %vm1708_vm0, %v1554_v44  ;;  %v316_v48 = vpop.permute.xlu1 %315  ;;  %v2083_v44 = vld [vmem:[%s4457_s1 + $0xd] ss:$0 sm:$0xff] }
  0xaa   :  { %v311_v49 = vpop.permute.xlu0 %310  ;;  %v1557_v50 = vmul.f32 %v2074_v45, %v316_v48  ;;  %635 = vperm.xlu1 %2331, %v101_v46   ;;  %v118_v46 = vld [vmem:[%s4456_s0 + $0x2d0] sm:$0xff] }
  0xab   :  { %v1556_v51 = vmul.f32 %v2074_v45, %v311_v49  ;;  %630 = vperm.xlu0 %2330, %v100_v47   ;;  %v119_v45 = vld [vmem:[%s4456_s0 + $0x2d8] sm:$0xff] }
  0xac   :  { %1718 = vst.msk [vmem:[%s4459_s3 + $0x48] sm:$0xff] %vm1708_vm0, %v1557_v50  ;;  %2167 = vst.msk [vmem:[%s4459_s3 + $0x588] sm:$0xff] %vm1708_vm0, %v1557_v50 }
  0xad   :  { %1717 = vst.msk [vmem:[%s4459_s3 + $0x40] sm:$0xff] %vm1708_vm0, %v1556_v51  ;;  %2166 = vst.msk [vmem:[%s4459_s3 + $0x580] sm:$0xff] %vm1708_vm0, %v1556_v51  ;;  %v326_v55 = vpop.permute.xlu1 %325  ;;  %v2084_v51 = vld [vmem:[%s4457_s1 + $0xe] ss:$0 sm:$0xff] }
  0xae   :  { %v321_v56 = vpop.permute.xlu0 %320  ;;  %v1559_v57 = vmul.f32 %v2075_v52, %v326_v55  ;;  %645 = vperm.xlu1 %2331, %v103_v53   ;;  %v120_v53 = vld [vmem:[%s4456_s0 + $0x2e0] sm:$0xff] }
  0xaf   :  { %v1558_v58 = vmul.f32 %v2075_v52, %v321_v56  ;;  %640 = vperm.xlu0 %2330, %v102_v54   ;;  %v121_v52 = vld [vmem:[%s4456_s0 + $0x2e8] sm:$0xff] }
  0xb0   :  { %1720 = vst.msk [vmem:[%s4459_s3 + $0x58] sm:$0xff] %vm1708_vm0, %v1559_v57  ;;  %2169 = vst.msk [vmem:[%s4459_s3 + $0x598] sm:$0xff] %vm1708_vm0, %v1559_v57 }
  0xb1   :  { %1719 = vst.msk [vmem:[%s4459_s3 + $0x50] sm:$0xff] %vm1708_vm0, %v1558_v58  ;;  %2168 = vst.msk [vmem:[%s4459_s3 + $0x590] sm:$0xff] %vm1708_vm0, %v1558_v58  ;;  %v336_v62 = vpop.permute.xlu1 %335  ;;  %v2085_v58 = vld [vmem:[%s4457_s1 + $0xf] ss:$0 sm:$0xff] }
  0xb2   :  { %v331_v63 = vpop.permute.xlu0 %330  ;;  %v1561_v0 = vmul.f32 %v2076_v59, %v336_v62  ;;  %655 = vperm.xlu1 %2331, %v105_v60   ;;  %v122_v60 = vld [vmem:[%s4456_s0 + $0x2f0] sm:$0xff] }
  0xb3   :  { %v1560_v1 = vmul.f32 %v2076_v59, %v331_v63  ;;  %650 = vperm.xlu0 %2330, %v104_v61   ;;  %v123_v59 = vld [vmem:[%s4456_s0 + $0x2f8] sm:$0xff] }
  0xb4   :  { %1722 = vst.msk [vmem:[%s4459_s3 + $0x68] sm:$0xff] %vm1708_vm0, %v1561_v0  ;;  %2171 = vst.msk [vmem:[%s4459_s3 + $0x5a8] sm:$0xff] %vm1708_vm0, %v1561_v0 }
  0xb5   :  { %1721 = vst.msk [vmem:[%s4459_s3 + $0x60] sm:$0xff] %vm1708_vm0, %v1560_v1  ;;  %2170 = vst.msk [vmem:[%s4459_s3 + $0x5a0] sm:$0xff] %vm1708_vm0, %v1560_v1  ;;  %v346_v5 = vpop.permute.xlu1 %345  ;;  %v2086_v1 = vld [vmem:[%s4457_s1 + $0x10] ss:$0 sm:$0xff] }
  0xb6   :  { %v341_v6 = vpop.permute.xlu0 %340  ;;  %v1563_v7 = vmul.f32 %v2077_v2, %v346_v5  ;;  %665 = vperm.xlu1 %2331, %v107_v3   ;;  %v124_v3 = vld [vmem:[%s4456_s0 + $0x300] sm:$0xff] }
  0xb7   :  { %v1562_v8 = vmul.f32 %v2077_v2, %v341_v6  ;;  %660 = vperm.xlu0 %2330, %v106_v4   ;;  %v125_v2 = vld [vmem:[%s4456_s0 + $0x308] sm:$0xff] }
  0xb8   :  { %1724 = vst.msk [vmem:[%s4459_s3 + $0x78] sm:$0xff] %vm1708_vm0, %v1563_v7  ;;  %2173 = vst.msk [vmem:[%s4459_s3 + $0x5b8] sm:$0xff] %vm1708_vm0, %v1563_v7 }
  0xb9   :  { %1723 = vst.msk [vmem:[%s4459_s3 + $0x70] sm:$0xff] %vm1708_vm0, %v1562_v8  ;;  %2172 = vst.msk [vmem:[%s4459_s3 + $0x5b0] sm:$0xff] %vm1708_vm0, %v1562_v8  ;;  %v356_v12 = vpop.permute.xlu1 %355  ;;  %v2087_v8 = vld [vmem:[%s4457_s1 + $0x11] ss:$0 sm:$0xff] }
  0xba   :  { %v351_v13 = vpop.permute.xlu0 %350  ;;  %v1565_v14 = vmul.f32 %v2078_v9, %v356_v12  ;;  %675 = vperm.xlu1 %2331, %v109_v10   ;;  %v126_v10 = vld [vmem:[%s4456_s0 + $0x310] sm:$0xff] }
  0xbb   :  { %v1564_v15 = vmul.f32 %v2078_v9, %v351_v13  ;;  %670 = vperm.xlu0 %2330, %v108_v11   ;;  %v127_v9 = vld [vmem:[%s4456_s0 + $0x318] sm:$0xff] }
  0xbc   :  { %1726 = vst.msk [vmem:[%s4459_s3 + $0x88] sm:$0xff] %vm1708_vm0, %v1565_v14  ;;  %2175 = vst.msk [vmem:[%s4459_s3 + $0x5c8] sm:$0xff] %vm1708_vm0, %v1565_v14 }
  0xbd   :  { %1725 = vst.msk [vmem:[%s4459_s3 + $0x80] sm:$0xff] %vm1708_vm0, %v1564_v15  ;;  %2174 = vst.msk [vmem:[%s4459_s3 + $0x5c0] sm:$0xff] %vm1708_vm0, %v1564_v15  ;;  %v366_v19 = vpop.permute.xlu1 %365  ;;  %v2088_v15 = vld [vmem:[%s4457_s1 + $0x12] ss:$0 sm:$0xff] }
  0xbe   :  { %v361_v20 = vpop.permute.xlu0 %360  ;;  %v1567_v21 = vmul.f32 %v2079_v16, %v366_v19  ;;  %685 = vperm.xlu1 %2331, %v111_v17   ;;  %v128_v17 = vld [vmem:[%s4456_s0 + $0x320] sm:$0xff] }
  0xbf   :  { %v1566_v22 = vmul.f32 %v2079_v16, %v361_v20  ;;  %680 = vperm.xlu0 %2330, %v110_v18   ;;  %v129_v16 = vld [vmem:[%s4456_s0 + $0x328] sm:$0xff] }
  0xc0   :  { %1728 = vst.msk [vmem:[%s4459_s3 + $0x98] sm:$0xff] %vm1708_vm0, %v1567_v21  ;;  %2177 = vst.msk [vmem:[%s4459_s3 + $0x5d8] sm:$0xff] %vm1708_vm0, %v1567_v21 }
  0xc1   :  { %1727 = vst.msk [vmem:[%s4459_s3 + $0x90] sm:$0xff] %vm1708_vm0, %v1566_v22  ;;  %2176 = vst.msk [vmem:[%s4459_s3 + $0x5d0] sm:$0xff] %vm1708_vm0, %v1566_v22  ;;  %v376_v26 = vpop.permute.xlu1 %375  ;;  %v2089_v22 = vld [vmem:[%s4457_s1 + $0x13] ss:$0 sm:$0xff] }
  0xc2   :  { %v371_v27 = vpop.permute.xlu0 %370  ;;  %v1569_v28 = vmul.f32 %v2080_v23, %v376_v26  ;;  %695 = vperm.xlu1 %2331, %v113_v24   ;;  %v130_v24 = vld [vmem:[%s4456_s0 + $0x330] sm:$0xff] }
  0xc3   :  { %v1568_v29 = vmul.f32 %v2080_v23, %v371_v27  ;;  %690 = vperm.xlu0 %2330, %v112_v25   ;;  %v131_v23 = vld [vmem:[%s4456_s0 + $0x338] sm:$0xff] }
  0xc4   :  { %1730 = vst.msk [vmem:[%s4459_s3 + $0xa8] sm:$0xff] %vm1708_vm0, %v1569_v28  ;;  %2179 = vst.msk [vmem:[%s4459_s3 + $0x5e8] sm:$0xff] %vm1708_vm0, %v1569_v28 }
  0xc5   :  { %1729 = vst.msk [vmem:[%s4459_s3 + $0xa0] sm:$0xff] %vm1708_vm0, %v1568_v29  ;;  %2178 = vst.msk [vmem:[%s4459_s3 + $0x5e0] sm:$0xff] %vm1708_vm0, %v1568_v29  ;;  %v386_v33 = vpop.permute.xlu1 %385  ;;  %v2090_v29 = vld [vmem:[%s4457_s1 + $0x14] ss:$0 sm:$0xff] }
  0xc6   :  { %v381_v34 = vpop.permute.xlu0 %380  ;;  %v1571_v35 = vmul.f32 %v2081_v30, %v386_v33  ;;  %705 = vperm.xlu1 %2331, %v115_v31   ;;  %v132_v31 = vld [vmem:[%s4456_s0 + $0x340] sm:$0xff] }
  0xc7   :  { %v1570_v36 = vmul.f32 %v2081_v30, %v381_v34  ;;  %700 = vperm.xlu0 %2330, %v114_v32   ;;  %v133_v30 = vld [vmem:[%s4456_s0 + $0x348] sm:$0xff] }
  0xc8   :  { %1732 = vst.msk [vmem:[%s4459_s3 + $0xb8] sm:$0xff] %vm1708_vm0, %v1571_v35  ;;  %2181 = vst.msk [vmem:[%s4459_s3 + $0x5f8] sm:$0xff] %vm1708_vm0, %v1571_v35 }
  0xc9   :  { %1731 = vst.msk [vmem:[%s4459_s3 + $0xb0] sm:$0xff] %vm1708_vm0, %v1570_v36  ;;  %2180 = vst.msk [vmem:[%s4459_s3 + $0x5f0] sm:$0xff] %vm1708_vm0, %v1570_v36  ;;  %v396_v40 = vpop.permute.xlu1 %395  ;;  %v2091_v36 = vld [vmem:[%s4457_s1 + $0x15] ss:$0 sm:$0xff] }
  0xca   :  { %v391_v41 = vpop.permute.xlu0 %390  ;;  %v1573_v42 = vmul.f32 %v2082_v37, %v396_v40  ;;  %715 = vperm.xlu1 %2331, %v117_v38   ;;  %v134_v38 = vld [vmem:[%s4456_s0 + $0x350] sm:$0xff] }
  0xcb   :  { %v1572_v43 = vmul.f32 %v2082_v37, %v391_v41  ;;  %710 = vperm.xlu0 %2330, %v116_v39   ;;  %v135_v37 = vld [vmem:[%s4456_s0 + $0x358] sm:$0xff] }
  0xcc   :  { %1734 = vst.msk [vmem:[%s4459_s3 + $0xc8] sm:$0xff] %vm1708_vm0, %v1573_v42  ;;  %2183 = vst.msk [vmem:[%s4459_s3 + $0x608] sm:$0xff] %vm1708_vm0, %v1573_v42 }
  0xcd   :  { %1733 = vst.msk [vmem:[%s4459_s3 + $0xc0] sm:$0xff] %vm1708_vm0, %v1572_v43  ;;  %2182 = vst.msk [vmem:[%s4459_s3 + $0x600] sm:$0xff] %vm1708_vm0, %v1572_v43  ;;  %v406_v47 = vpop.permute.xlu1 %405  ;;  %v2092_v43 = vld [vmem:[%s4457_s1 + $0x16] ss:$0 sm:$0xff] }
  0xce   :  { %v401_v48 = vpop.permute.xlu0 %400  ;;  %v1575_v49 = vmul.f32 %v2083_v44, %v406_v47  ;;  %725 = vperm.xlu1 %2331, %v119_v45   ;;  %v136_v45 = vld [vmem:[%s4456_s0 + $0x360] sm:$0xff] }
  0xcf   :  { %v1574_v50 = vmul.f32 %v2083_v44, %v401_v48  ;;  %720 = vperm.xlu0 %2330, %v118_v46   ;;  %v137_v44 = vld [vmem:[%s4456_s0 + $0x368] sm:$0xff] }
  0xd0   :  { %1736 = vst.msk [vmem:[%s4459_s3 + $0xd8] sm:$0xff] %vm1708_vm0, %v1575_v49  ;;  %2185 = vst.msk [vmem:[%s4459_s3 + $0x618] sm:$0xff] %vm1708_vm0, %v1575_v49 }
  0xd1   :  { %1735 = vst.msk [vmem:[%s4459_s3 + $0xd0] sm:$0xff] %vm1708_vm0, %v1574_v50  ;;  %2184 = vst.msk [vmem:[%s4459_s3 + $0x610] sm:$0xff] %vm1708_vm0, %v1574_v50  ;;  %v416_v54 = vpop.permute.xlu1 %415  ;;  %v2093_v50 = vld [vmem:[%s4457_s1 + $0x17] ss:$0 sm:$0xff] }
  0xd2   :  { %v411_v55 = vpop.permute.xlu0 %410  ;;  %v1577_v56 = vmul.f32 %v2084_v51, %v416_v54  ;;  %735 = vperm.xlu1 %2331, %v121_v52   ;;  %v138_v52 = vld [vmem:[%s4456_s0 + $0x370] sm:$0xff] }
  0xd3   :  { %v1576_v57 = vmul.f32 %v2084_v51, %v411_v55  ;;  %730 = vperm.xlu0 %2330, %v120_v53   ;;  %v139_v51 = vld [vmem:[%s4456_s0 + $0x378] sm:$0xff] }
  0xd4   :  { %1738 = vst.msk [vmem:[%s4459_s3 + $0xe8] sm:$0xff] %vm1708_vm0, %v1577_v56  ;;  %2187 = vst.msk [vmem:[%s4459_s3 + $0x628] sm:$0xff] %vm1708_vm0, %v1577_v56 }
  0xd5   :  { %1737 = vst.msk [vmem:[%s4459_s3 + $0xe0] sm:$0xff] %vm1708_vm0, %v1576_v57  ;;  %2186 = vst.msk [vmem:[%s4459_s3 + $0x620] sm:$0xff] %vm1708_vm0, %v1576_v57  ;;  %v426_v61 = vpop.permute.xlu1 %425  ;;  %v2094_v57 = vld [vmem:[%s4457_s1 + $0x18] ss:$0 sm:$0xff] }
  0xd6   :  { %v421_v62 = vpop.permute.xlu0 %420  ;;  %v1579_v63 = vmul.f32 %v2085_v58, %v426_v61  ;;  %745 = vperm.xlu1 %2331, %v123_v59   ;;  %v140_v59 = vld [vmem:[%s4456_s0 + $0x380] sm:$0xff] }
  0xd7   :  { %v1578_v0 = vmul.f32 %v2085_v58, %v421_v62  ;;  %740 = vperm.xlu0 %2330, %v122_v60   ;;  %v141_v58 = vld [vmem:[%s4456_s0 + $0x388] sm:$0xff] }
  0xd8   :  { %1740 = vst.msk [vmem:[%s4459_s3 + $0xf8] sm:$0xff] %vm1708_vm0, %v1579_v63  ;;  %2189 = vst.msk [vmem:[%s4459_s3 + $0x638] sm:$0xff] %vm1708_vm0, %v1579_v63 }
  0xd9   :  { %1739 = vst.msk [vmem:[%s4459_s3 + $0xf0] sm:$0xff] %vm1708_vm0, %v1578_v0  ;;  %2188 = vst.msk [vmem:[%s4459_s3 + $0x630] sm:$0xff] %vm1708_vm0, %v1578_v0  ;;  %v436_v4 = vpop.permute.xlu1 %435  ;;  %v2095_v0 = vld [vmem:[%s4457_s1 + $0x19] ss:$0 sm:$0xff] }
  0xda   :  { %v431_v5 = vpop.permute.xlu0 %430  ;;  %v1581_v6 = vmul.f32 %v2086_v1, %v436_v4  ;;  %755 = vperm.xlu1 %2331, %v125_v2   ;;  %v142_v2 = vld [vmem:[%s4456_s0 + $0x390] sm:$0xff] }
  0xdb   :  { %v1580_v7 = vmul.f32 %v2086_v1, %v431_v5  ;;  %750 = vperm.xlu0 %2330, %v124_v3   ;;  %v143_v1 = vld [vmem:[%s4456_s0 + $0x398] sm:$0xff] }
  0xdc   :  { %1742 = vst.msk [vmem:[%s4459_s3 + $0x108] sm:$0xff] %vm1708_vm0, %v1581_v6  ;;  %2191 = vst.msk [vmem:[%s4459_s3 + $0x648] sm:$0xff] %vm1708_vm0, %v1581_v6 }
  0xdd   :  { %1741 = vst.msk [vmem:[%s4459_s3 + $0x100] sm:$0xff] %vm1708_vm0, %v1580_v7  ;;  %2190 = vst.msk [vmem:[%s4459_s3 + $0x640] sm:$0xff] %vm1708_vm0, %v1580_v7  ;;  %v446_v11 = vpop.permute.xlu1 %445  ;;  %v2096_v7 = vld [vmem:[%s4457_s1 + $0x1a] ss:$0 sm:$0xff] }
  0xde   :  { %v441_v12 = vpop.permute.xlu0 %440  ;;  %v1583_v13 = vmul.f32 %v2087_v8, %v446_v11  ;;  %765 = vperm.xlu1 %2331, %v127_v9   ;;  %v144_v9 = vld [vmem:[%s4456_s0 + $0x3a0] sm:$0xff] }
  0xdf   :  { %v1582_v14 = vmul.f32 %v2087_v8, %v441_v12  ;;  %760 = vperm.xlu0 %2330, %v126_v10   ;;  %v145_v8 = vld [vmem:[%s4456_s0 + $0x3a8] sm:$0xff] }
  0xe0   :  { %1744 = vst.msk [vmem:[%s4459_s3 + $0x118] sm:$0xff] %vm1708_vm0, %v1583_v13  ;;  %2193 = vst.msk [vmem:[%s4459_s3 + $0x658] sm:$0xff] %vm1708_vm0, %v1583_v13 }
  0xe1   :  { %1743 = vst.msk [vmem:[%s4459_s3 + $0x110] sm:$0xff] %vm1708_vm0, %v1582_v14  ;;  %2192 = vst.msk [vmem:[%s4459_s3 + $0x650] sm:$0xff] %vm1708_vm0, %v1582_v14  ;;  %v456_v18 = vpop.permute.xlu1 %455  ;;  %v2097_v14 = vld [vmem:[%s4457_s1 + $0x1b] ss:$0 sm:$0xff] }
  0xe2   :  { %v451_v19 = vpop.permute.xlu0 %450  ;;  %v1585_v20 = vmul.f32 %v2088_v15, %v456_v18  ;;  %775 = vperm.xlu1 %2331, %v129_v16   ;;  %v146_v16 = vld [vmem:[%s4456_s0 + $0x3b0] sm:$0xff] }
  0xe3   :  { %v1584_v21 = vmul.f32 %v2088_v15, %v451_v19  ;;  %770 = vperm.xlu0 %2330, %v128_v17   ;;  %v147_v15 = vld [vmem:[%s4456_s0 + $0x3b8] sm:$0xff] }
  0xe4   :  { %1746 = vst.msk [vmem:[%s4459_s3 + $0x128] sm:$0xff] %vm1708_vm0, %v1585_v20  ;;  %2195 = vst.msk [vmem:[%s4459_s3 + $0x668] sm:$0xff] %vm1708_vm0, %v1585_v20 }
  0xe5   :  { %1745 = vst.msk [vmem:[%s4459_s3 + $0x120] sm:$0xff] %vm1708_vm0, %v1584_v21  ;;  %2194 = vst.msk [vmem:[%s4459_s3 + $0x660] sm:$0xff] %vm1708_vm0, %v1584_v21  ;;  %v466_v25 = vpop.permute.xlu1 %465  ;;  %v2098_v21 = vld [vmem:[%s4457_s1 + $0x1c] ss:$0 sm:$0xff] }
  0xe6   :  { %v461_v26 = vpop.permute.xlu0 %460  ;;  %v1587_v27 = vmul.f32 %v2089_v22, %v466_v25  ;;  %785 = vperm.xlu1 %2331, %v131_v23   ;;  %v148_v23 = vld [vmem:[%s4456_s0 + $0x3c0] sm:$0xff] }
  0xe7   :  { %v1586_v28 = vmul.f32 %v2089_v22, %v461_v26  ;;  %780 = vperm.xlu0 %2330, %v130_v24   ;;  %v149_v22 = vld [vmem:[%s4456_s0 + $0x3c8] sm:$0xff] }
  0xe8   :  { %1748 = vst.msk [vmem:[%s4459_s3 + $0x138] sm:$0xff] %vm1708_vm0, %v1587_v27  ;;  %2197 = vst.msk [vmem:[%s4459_s3 + $0x678] sm:$0xff] %vm1708_vm0, %v1587_v27 }
  0xe9   :  { %1747 = vst.msk [vmem:[%s4459_s3 + $0x130] sm:$0xff] %vm1708_vm0, %v1586_v28  ;;  %2196 = vst.msk [vmem:[%s4459_s3 + $0x670] sm:$0xff] %vm1708_vm0, %v1586_v28  ;;  %v476_v32 = vpop.permute.xlu1 %475  ;;  %v2099_v28 = vld [vmem:[%s4457_s1 + $0x1d] ss:$0 sm:$0xff] }
  0xea   :  { %v471_v33 = vpop.permute.xlu0 %470  ;;  %v1589_v34 = vmul.f32 %v2090_v29, %v476_v32  ;;  %795 = vperm.xlu1 %2331, %v133_v30   ;;  %v150_v30 = vld [vmem:[%s4456_s0 + $0x3d0] sm:$0xff] }
  0xeb   :  { %v1588_v35 = vmul.f32 %v2090_v29, %v471_v33  ;;  %790 = vperm.xlu0 %2330, %v132_v31   ;;  %v151_v29 = vld [vmem:[%s4456_s0 + $0x3d8] sm:$0xff] }
  0xec   :  { %1750 = vst.msk [vmem:[%s4459_s3 + $0x148] sm:$0xff] %vm1708_vm0, %v1589_v34  ;;  %2199 = vst.msk [vmem:[%s4459_s3 + $0x688] sm:$0xff] %vm1708_vm0, %v1589_v34 }
  0xed   :  { %1749 = vst.msk [vmem:[%s4459_s3 + $0x140] sm:$0xff] %vm1708_vm0, %v1588_v35  ;;  %2198 = vst.msk [vmem:[%s4459_s3 + $0x680] sm:$0xff] %vm1708_vm0, %v1588_v35  ;;  %v486_v39 = vpop.permute.xlu1 %485  ;;  %v2100_v35 = vld [vmem:[%s4457_s1 + $0x1e] ss:$0 sm:$0xff] }
  0xee   :  { %v481_v40 = vpop.permute.xlu0 %480  ;;  %v1591_v41 = vmul.f32 %v2091_v36, %v486_v39  ;;  %805 = vperm.xlu1 %2331, %v135_v37   ;;  %v152_v37 = vld [vmem:[%s4456_s0 + $0x3e0] sm:$0xff] }
  0xef   :  { %v1590_v42 = vmul.f32 %v2091_v36, %v481_v40  ;;  %800 = vperm.xlu0 %2330, %v134_v38   ;;  %v153_v36 = vld [vmem:[%s4456_s0 + $0x3e8] sm:$0xff] }
  0xf0   :  { %1752 = vst.msk [vmem:[%s4459_s3 + $0x158] sm:$0xff] %vm1708_vm0, %v1591_v41  ;;  %2201 = vst.msk [vmem:[%s4459_s3 + $0x698] sm:$0xff] %vm1708_vm0, %v1591_v41 }
  0xf1   :  { %1751 = vst.msk [vmem:[%s4459_s3 + $0x150] sm:$0xff] %vm1708_vm0, %v1590_v42  ;;  %2200 = vst.msk [vmem:[%s4459_s3 + $0x690] sm:$0xff] %vm1708_vm0, %v1590_v42  ;;  %v496_v46 = vpop.permute.xlu1 %495  ;;  %v2101_v42 = vld [vmem:[%s4457_s1 + $0x1f] ss:$0 sm:$0xff] }
  0xf2   :  { %v491_v47 = vpop.permute.xlu0 %490  ;;  %v1593_v48 = vmul.f32 %v2092_v43, %v496_v46  ;;  %815 = vperm.xlu1 %2331, %v137_v44   ;;  %v154_v44 = vld [vmem:[%s4456_s0 + $0x3f0] sm:$0xff] }
  0xf3   :  { %v1592_v49 = vmul.f32 %v2092_v43, %v491_v47  ;;  %810 = vperm.xlu0 %2330, %v136_v45   ;;  %v155_v43 = vld [vmem:[%s4456_s0 + $0x3f8] sm:$0xff] }
  0xf4   :  { %1754 = vst.msk [vmem:[%s4459_s3 + $0x168] sm:$0xff] %vm1708_vm0, %v1593_v48  ;;  %2203 = vst.msk [vmem:[%s4459_s3 + $0x6a8] sm:$0xff] %vm1708_vm0, %v1593_v48 }
  0xf5   :  { %1753 = vst.msk [vmem:[%s4459_s3 + $0x160] sm:$0xff] %vm1708_vm0, %v1592_v49  ;;  %2202 = vst.msk [vmem:[%s4459_s3 + $0x6a0] sm:$0xff] %vm1708_vm0, %v1592_v49  ;;  %v506_v53 = vpop.permute.xlu1 %505  ;;  %v2102_v49 = vld [vmem:[%s4457_s1 + $0x20] ss:$0 sm:$0xff] }
  0xf6   :  { %v501_v54 = vpop.permute.xlu0 %500  ;;  %v1595_v55 = vmul.f32 %v2093_v50, %v506_v53  ;;  %825 = vperm.xlu1 %2331, %v139_v51   ;;  %v156_v51 = vld [vmem:[%s4456_s0 + $0x400] sm:$0xff] }
  0xf7   :  { %v1594_v56 = vmul.f32 %v2093_v50, %v501_v54  ;;  %820 = vperm.xlu0 %2330, %v138_v52   ;;  %v157_v50 = vld [vmem:[%s4456_s0 + $0x408] sm:$0xff] }
  0xf8   :  { %1756 = vst.msk [vmem:[%s4459_s3 + $0x178] sm:$0xff] %vm1708_vm0, %v1595_v55  ;;  %2205 = vst.msk [vmem:[%s4459_s3 + $0x6b8] sm:$0xff] %vm1708_vm0, %v1595_v55 }
  0xf9   :  { %1755 = vst.msk [vmem:[%s4459_s3 + $0x170] sm:$0xff] %vm1708_vm0, %v1594_v56  ;;  %2204 = vst.msk [vmem:[%s4459_s3 + $0x6b0] sm:$0xff] %vm1708_vm0, %v1594_v56  ;;  %v516_v60 = vpop.permute.xlu1 %515  ;;  %v2103_v56 = vld [vmem:[%s4457_s1 + $0x21] ss:$0 sm:$0xff] }
  0xfa   :  { %v511_v61 = vpop.permute.xlu0 %510  ;;  %v1597_v62 = vmul.f32 %v2094_v57, %v516_v60  ;;  %835 = vperm.xlu1 %2331, %v141_v58   ;;  %v158_v58 = vld [vmem:[%s4456_s0 + $0x410] sm:$0xff] }
  0xfb   :  { %v1596_v63 = vmul.f32 %v2094_v57, %v511_v61  ;;  %830 = vperm.xlu0 %2330, %v140_v59   ;;  %v159_v57 = vld [vmem:[%s4456_s0 + $0x418] sm:$0xff] }
  0xfc   :  { %1758 = vst.msk [vmem:[%s4459_s3 + $0x188] sm:$0xff] %vm1708_vm0, %v1597_v62  ;;  %2207 = vst.msk [vmem:[%s4459_s3 + $0x6c8] sm:$0xff] %vm1708_vm0, %v1597_v62 }
  0xfd   :  { %1757 = vst.msk [vmem:[%s4459_s3 + $0x180] sm:$0xff] %vm1708_vm0, %v1596_v63  ;;  %2206 = vst.msk [vmem:[%s4459_s3 + $0x6c0] sm:$0xff] %vm1708_vm0, %v1596_v63  ;;  %v526_v3 = vpop.permute.xlu1 %525  ;;  %v2104_v63 = vld [vmem:[%s4457_s1 + $0x22] ss:$0 sm:$0xff] }
  0xfe   :  { %v521_v4 = vpop.permute.xlu0 %520  ;;  %v1599_v5 = vmul.f32 %v2095_v0, %v526_v3  ;;  %845 = vperm.xlu1 %2331, %v143_v1   ;;  %v160_v1 = vld [vmem:[%s4456_s0 + $0x420] sm:$0xff] }
  0xff   :  { %v1598_v6 = vmul.f32 %v2095_v0, %v521_v4  ;;  %840 = vperm.xlu0 %2330, %v142_v2   ;;  %v161_v0 = vld [vmem:[%s4456_s0 + $0x428] sm:$0xff] }
 0x100   :  { %1760 = vst.msk [vmem:[%s4459_s3 + $0x198] sm:$0xff] %vm1708_vm0, %v1599_v5  ;;  %2209 = vst.msk [vmem:[%s4459_s3 + $0x6d8] sm:$0xff] %vm1708_vm0, %v1599_v5 }
 0x101   :  { %1759 = vst.msk [vmem:[%s4459_s3 + $0x190] sm:$0xff] %vm1708_vm0, %v1598_v6  ;;  %2208 = vst.msk [vmem:[%s4459_s3 + $0x6d0] sm:$0xff] %vm1708_vm0, %v1598_v6  ;;  %v536_v10 = vpop.permute.xlu1 %535  ;;  %v2105_v6 = vld [vmem:[%s4457_s1 + $0x23] ss:$0 sm:$0xff] }
 0x102   :  { %v531_v11 = vpop.permute.xlu0 %530  ;;  %v1601_v12 = vmul.f32 %v2096_v7, %v536_v10  ;;  %855 = vperm.xlu1 %2331, %v145_v8   ;;  %v162_v8 = vld [vmem:[%s4456_s0 + $0x430] sm:$0xff] }
 0x103   :  { %v1600_v13 = vmul.f32 %v2096_v7, %v531_v11  ;;  %850 = vperm.xlu0 %2330, %v144_v9   ;;  %v163_v7 = vld [vmem:[%s4456_s0 + $0x438] sm:$0xff] }
 0x104   :  { %1762 = vst.msk [vmem:[%s4459_s3 + $0x1a8] sm:$0xff] %vm1708_vm0, %v1601_v12  ;;  %2211 = vst.msk [vmem:[%s4459_s3 + $0x6e8] sm:$0xff] %vm1708_vm0, %v1601_v12 }
 0x105   :  { %1761 = vst.msk [vmem:[%s4459_s3 + $0x1a0] sm:$0xff] %vm1708_vm0, %v1600_v13  ;;  %2210 = vst.msk [vmem:[%s4459_s3 + $0x6e0] sm:$0xff] %vm1708_vm0, %v1600_v13  ;;  %v546_v17 = vpop.permute.xlu1 %545  ;;  %v2106_v13 = vld [vmem:[%s4457_s1 + $0x24] ss:$0 sm:$0xff] }
 0x106   :  { %v541_v18 = vpop.permute.xlu0 %540  ;;  %v1603_v19 = vmul.f32 %v2097_v14, %v546_v17  ;;  %865 = vperm.xlu1 %2331, %v147_v15   ;;  %v164_v15 = vld [vmem:[%s4456_s0 + $0x440] sm:$0xff] }
 0x107   :  { %v1602_v20 = vmul.f32 %v2097_v14, %v541_v18  ;;  %860 = vperm.xlu0 %2330, %v146_v16   ;;  %v165_v14 = vld [vmem:[%s4456_s0 + $0x448] sm:$0xff] }
 0x108   :  { %1764 = vst.msk [vmem:[%s4459_s3 + $0x1b8] sm:$0xff] %vm1708_vm0, %v1603_v19  ;;  %2213 = vst.msk [vmem:[%s4459_s3 + $0x6f8] sm:$0xff] %vm1708_vm0, %v1603_v19 }
 0x109   :  { %1763 = vst.msk [vmem:[%s4459_s3 + $0x1b0] sm:$0xff] %vm1708_vm0, %v1602_v20  ;;  %2212 = vst.msk [vmem:[%s4459_s3 + $0x6f0] sm:$0xff] %vm1708_vm0, %v1602_v20  ;;  %v556_v24 = vpop.permute.xlu1 %555  ;;  %v2107_v20 = vld [vmem:[%s4457_s1 + $0x25] ss:$0 sm:$0xff] }
 0x10a   :  { %v551_v25 = vpop.permute.xlu0 %550  ;;  %v1605_v26 = vmul.f32 %v2098_v21, %v556_v24  ;;  %875 = vperm.xlu1 %2331, %v149_v22   ;;  %v166_v22 = vld [vmem:[%s4456_s0 + $0x450] sm:$0xff] }
 0x10b   :  { %v1604_v27 = vmul.f32 %v2098_v21, %v551_v25  ;;  %870 = vperm.xlu0 %2330, %v148_v23   ;;  %v167_v21 = vld [vmem:[%s4456_s0 + $0x458] sm:$0xff] }
 0x10c   :  { %1766 = vst.msk [vmem:[%s4459_s3 + $0x1c8] sm:$0xff] %vm1708_vm0, %v1605_v26  ;;  %2215 = vst.msk [vmem:[%s4459_s3 + $0x708] sm:$0xff] %vm1708_vm0, %v1605_v26 }
 0x10d   :  { %1765 = vst.msk [vmem:[%s4459_s3 + $0x1c0] sm:$0xff] %vm1708_vm0, %v1604_v27  ;;  %2214 = vst.msk [vmem:[%s4459_s3 + $0x700] sm:$0xff] %vm1708_vm0, %v1604_v27  ;;  %v566_v31 = vpop.permute.xlu1 %565  ;;  %v2108_v27 = vld [vmem:[%s4457_s1 + $0x26] ss:$0 sm:$0xff] }
 0x10e   :  { %v561_v32 = vpop.permute.xlu0 %560  ;;  %v1607_v33 = vmul.f32 %v2099_v28, %v566_v31  ;;  %885 = vperm.xlu1 %2331, %v151_v29   ;;  %v168_v29 = vld [vmem:[%s4456_s0 + $0x460] sm:$0xff] }
 0x10f   :  { %v1606_v34 = vmul.f32 %v2099_v28, %v561_v32  ;;  %880 = vperm.xlu0 %2330, %v150_v30   ;;  %v169_v28 = vld [vmem:[%s4456_s0 + $0x468] sm:$0xff] }
 0x110   :  { %1768 = vst.msk [vmem:[%s4459_s3 + $0x1d8] sm:$0xff] %vm1708_vm0, %v1607_v33  ;;  %2217 = vst.msk [vmem:[%s4459_s3 + $0x718] sm:$0xff] %vm1708_vm0, %v1607_v33 }
 0x111   :  { %1767 = vst.msk [vmem:[%s4459_s3 + $0x1d0] sm:$0xff] %vm1708_vm0, %v1606_v34  ;;  %2216 = vst.msk [vmem:[%s4459_s3 + $0x710] sm:$0xff] %vm1708_vm0, %v1606_v34  ;;  %v576_v38 = vpop.permute.xlu1 %575  ;;  %v2109_v34 = vld [vmem:[%s4457_s1 + $0x27] ss:$0 sm:$0xff] }
 0x112   :  { %v571_v39 = vpop.permute.xlu0 %570  ;;  %v1609_v40 = vmul.f32 %v2100_v35, %v576_v38  ;;  %895 = vperm.xlu1 %2331, %v153_v36   ;;  %v170_v36 = vld [vmem:[%s4456_s0 + $0x470] sm:$0xff] }
 0x113   :  { %v1608_v41 = vmul.f32 %v2100_v35, %v571_v39  ;;  %890 = vperm.xlu0 %2330, %v152_v37   ;;  %v171_v35 = vld [vmem:[%s4456_s0 + $0x478] sm:$0xff] }
 0x114   :  { %1770 = vst.msk [vmem:[%s4459_s3 + $0x1e8] sm:$0xff] %vm1708_vm0, %v1609_v40  ;;  %2219 = vst.msk [vmem:[%s4459_s3 + $0x728] sm:$0xff] %vm1708_vm0, %v1609_v40 }
 0x115   :  { %1769 = vst.msk [vmem:[%s4459_s3 + $0x1e0] sm:$0xff] %vm1708_vm0, %v1608_v41  ;;  %2218 = vst.msk [vmem:[%s4459_s3 + $0x720] sm:$0xff] %vm1708_vm0, %v1608_v41  ;;  %v586_v45 = vpop.permute.xlu1 %585  ;;  %v2110_v41 = vld [vmem:[%s4457_s1 + $0x28] ss:$0 sm:$0xff] }
 0x116   :  { %v581_v46 = vpop.permute.xlu0 %580  ;;  %v1611_v47 = vmul.f32 %v2101_v42, %v586_v45  ;;  %905 = vperm.xlu1 %2331, %v155_v43   ;;  %v172_v43 = vld [vmem:[%s4456_s0 + $0x480] sm:$0xff] }
 0x117   :  { %v1610_v48 = vmul.f32 %v2101_v42, %v581_v46  ;;  %900 = vperm.xlu0 %2330, %v154_v44   ;;  %v173_v42 = vld [vmem:[%s4456_s0 + $0x488] sm:$0xff] }
 0x118   :  { %1772 = vst.msk [vmem:[%s4459_s3 + $0x1f8] sm:$0xff] %vm1708_vm0, %v1611_v47  ;;  %2221 = vst.msk [vmem:[%s4459_s3 + $0x738] sm:$0xff] %vm1708_vm0, %v1611_v47 }
 0x119   :  { %1771 = vst.msk [vmem:[%s4459_s3 + $0x1f0] sm:$0xff] %vm1708_vm0, %v1610_v48  ;;  %2220 = vst.msk [vmem:[%s4459_s3 + $0x730] sm:$0xff] %vm1708_vm0, %v1610_v48  ;;  %v596_v52 = vpop.permute.xlu1 %595  ;;  %v2111_v48 = vld [vmem:[%s4457_s1 + $0x29] ss:$0 sm:$0xff] }
 0x11a   :  { %v591_v53 = vpop.permute.xlu0 %590  ;;  %v1613_v54 = vmul.f32 %v2102_v49, %v596_v52  ;;  %915 = vperm.xlu1 %2331, %v157_v50   ;;  %v174_v50 = vld [vmem:[%s4456_s0 + $0x490] sm:$0xff] }
 0x11b   :  { %v1612_v55 = vmul.f32 %v2102_v49, %v591_v53  ;;  %910 = vperm.xlu0 %2330, %v156_v51   ;;  %v175_v49 = vld [vmem:[%s4456_s0 + $0x498] sm:$0xff] }
 0x11c   :  { %1774 = vst.msk [vmem:[%s4459_s3 + $0x208] sm:$0xff] %vm1708_vm0, %v1613_v54  ;;  %2223 = vst.msk [vmem:[%s4459_s3 + $0x748] sm:$0xff] %vm1708_vm0, %v1613_v54 }
 0x11d   :  { %1773 = vst.msk [vmem:[%s4459_s3 + $0x200] sm:$0xff] %vm1708_vm0, %v1612_v55  ;;  %2222 = vst.msk [vmem:[%s4459_s3 + $0x740] sm:$0xff] %vm1708_vm0, %v1612_v55  ;;  %v606_v59 = vpop.permute.xlu1 %605  ;;  %v2112_v55 = vld [vmem:[%s4457_s1 + $0x2a] ss:$0 sm:$0xff] }
 0x11e   :  { %v601_v60 = vpop.permute.xlu0 %600  ;;  %v1615_v61 = vmul.f32 %v2103_v56, %v606_v59  ;;  %925 = vperm.xlu1 %2331, %v159_v57   ;;  %v176_v57 = vld [vmem:[%s4456_s0 + $0x4a0] sm:$0xff] }
 0x11f   :  { %v1614_v62 = vmul.f32 %v2103_v56, %v601_v60  ;;  %920 = vperm.xlu0 %2330, %v158_v58   ;;  %v177_v56 = vld [vmem:[%s4456_s0 + $0x4a8] sm:$0xff] }
 0x120   :  { %1776 = vst.msk [vmem:[%s4459_s3 + $0x218] sm:$0xff] %vm1708_vm0, %v1615_v61  ;;  %2225 = vst.msk [vmem:[%s4459_s3 + $0x758] sm:$0xff] %vm1708_vm0, %v1615_v61 }
 0x121   :  { %1775 = vst.msk [vmem:[%s4459_s3 + $0x210] sm:$0xff] %vm1708_vm0, %v1614_v62  ;;  %2224 = vst.msk [vmem:[%s4459_s3 + $0x750] sm:$0xff] %vm1708_vm0, %v1614_v62  ;;  %v616_v2 = vpop.permute.xlu1 %615  ;;  %v2113_v62 = vld [vmem:[%s4457_s1 + $0x2b] ss:$0 sm:$0xff] }
 0x122   :  { %v611_v3 = vpop.permute.xlu0 %610  ;;  %v1617_v4 = vmul.f32 %v2104_v63, %v616_v2  ;;  %935 = vperm.xlu1 %2331, %v161_v0   ;;  %v178_v0 = vld [vmem:[%s4456_s0 + $0x4b0] sm:$0xff] }
 0x123   :  { %v1616_v5 = vmul.f32 %v2104_v63, %v611_v3  ;;  %930 = vperm.xlu0 %2330, %v160_v1   ;;  %v179_v63 = vld [vmem:[%s4456_s0 + $0x4b8] sm:$0xff] }
 0x124   :  { %1778 = vst.msk [vmem:[%s4459_s3 + $0x228] sm:$0xff] %vm1708_vm0, %v1617_v4  ;;  %2227 = vst.msk [vmem:[%s4459_s3 + $0x768] sm:$0xff] %vm1708_vm0, %v1617_v4 }
 0x125   :  { %1777 = vst.msk [vmem:[%s4459_s3 + $0x220] sm:$0xff] %vm1708_vm0, %v1616_v5  ;;  %2226 = vst.msk [vmem:[%s4459_s3 + $0x760] sm:$0xff] %vm1708_vm0, %v1616_v5  ;;  %v626_v9 = vpop.permute.xlu1 %625  ;;  %v2114_v5 = vld [vmem:[%s4457_s1 + $0x2c] ss:$0 sm:$0xff] }
 0x126   :  { %v621_v10 = vpop.permute.xlu0 %620  ;;  %v1619_v11 = vmul.f32 %v2105_v6, %v626_v9  ;;  %945 = vperm.xlu1 %2331, %v163_v7   ;;  %v180_v7 = vld [vmem:[%s4456_s0 + $0x4c0] sm:$0xff] }
 0x127   :  { %v1618_v12 = vmul.f32 %v2105_v6, %v621_v10  ;;  %940 = vperm.xlu0 %2330, %v162_v8   ;;  %v181_v6 = vld [vmem:[%s4456_s0 + $0x4c8] sm:$0xff] }
 0x128   :  { %1780 = vst.msk [vmem:[%s4459_s3 + $0x238] sm:$0xff] %vm1708_vm0, %v1619_v11  ;;  %2229 = vst.msk [vmem:[%s4459_s3 + $0x778] sm:$0xff] %vm1708_vm0, %v1619_v11 }
 0x129   :  { %1779 = vst.msk [vmem:[%s4459_s3 + $0x230] sm:$0xff] %vm1708_vm0, %v1618_v12  ;;  %2228 = vst.msk [vmem:[%s4459_s3 + $0x770] sm:$0xff] %vm1708_vm0, %v1618_v12  ;;  %v636_v16 = vpop.permute.xlu1 %635  ;;  %v2115_v12 = vld [vmem:[%s4457_s1 + $0x2d] ss:$0 sm:$0xff] }
 0x12a   :  { %v631_v17 = vpop.permute.xlu0 %630  ;;  %v1621_v18 = vmul.f32 %v2106_v13, %v636_v16  ;;  %955 = vperm.xlu1 %2331, %v165_v14   ;;  %v182_v14 = vld [vmem:[%s4456_s0 + $0x4d0] sm:$0xff] }
 0x12b   :  { %v1620_v19 = vmul.f32 %v2106_v13, %v631_v17  ;;  %950 = vperm.xlu0 %2330, %v164_v15   ;;  %v183_v13 = vld [vmem:[%s4456_s0 + $0x4d8] sm:$0xff] }
 0x12c   :  { %1782 = vst.msk [vmem:[%s4459_s3 + $0x248] sm:$0xff] %vm1708_vm0, %v1621_v18  ;;  %2231 = vst.msk [vmem:[%s4459_s3 + $0x788] sm:$0xff] %vm1708_vm0, %v1621_v18 }
 0x12d   :  { %1781 = vst.msk [vmem:[%s4459_s3 + $0x240] sm:$0xff] %vm1708_vm0, %v1620_v19  ;;  %2230 = vst.msk [vmem:[%s4459_s3 + $0x780] sm:$0xff] %vm1708_vm0, %v1620_v19  ;;  %v646_v23 = vpop.permute.xlu1 %645  ;;  %v2116_v19 = vld [vmem:[%s4457_s1 + $0x2e] ss:$0 sm:$0xff] }
 0x12e   :  { %v641_v24 = vpop.permute.xlu0 %640  ;;  %v1623_v25 = vmul.f32 %v2107_v20, %v646_v23  ;;  %965 = vperm.xlu1 %2331, %v167_v21   ;;  %v184_v21 = vld [vmem:[%s4456_s0 + $0x4e0] sm:$0xff] }
 0x12f   :  { %v1622_v26 = vmul.f32 %v2107_v20, %v641_v24  ;;  %960 = vperm.xlu0 %2330, %v166_v22   ;;  %v185_v20 = vld [vmem:[%s4456_s0 + $0x4e8] sm:$0xff] }
 0x130   :  { %1784 = vst.msk [vmem:[%s4459_s3 + $0x258] sm:$0xff] %vm1708_vm0, %v1623_v25  ;;  %2233 = vst.msk [vmem:[%s4459_s3 + $0x798] sm:$0xff] %vm1708_vm0, %v1623_v25 }
 0x131   :  { %1783 = vst.msk [vmem:[%s4459_s3 + $0x250] sm:$0xff] %vm1708_vm0, %v1622_v26  ;;  %2232 = vst.msk [vmem:[%s4459_s3 + $0x790] sm:$0xff] %vm1708_vm0, %v1622_v26  ;;  %v656_v30 = vpop.permute.xlu1 %655  ;;  %v2117_v26 = vld [vmem:[%s4457_s1 + $0x2f] ss:$0 sm:$0xff] }
 0x132   :  { %v651_v31 = vpop.permute.xlu0 %650  ;;  %v1625_v32 = vmul.f32 %v2108_v27, %v656_v30  ;;  %975 = vperm.xlu1 %2331, %v169_v28   ;;  %v186_v28 = vld [vmem:[%s4456_s0 + $0x4f0] sm:$0xff] }
 0x133   :  { %v1624_v33 = vmul.f32 %v2108_v27, %v651_v31  ;;  %970 = vperm.xlu0 %2330, %v168_v29   ;;  %v187_v27 = vld [vmem:[%s4456_s0 + $0x4f8] sm:$0xff] }
 0x134   :  { %1786 = vst.msk [vmem:[%s4459_s3 + $0x268] sm:$0xff] %vm1708_vm0, %v1625_v32  ;;  %2235 = vst.msk [vmem:[%s4459_s3 + $0x7a8] sm:$0xff] %vm1708_vm0, %v1625_v32 }
 0x135   :  { %1785 = vst.msk [vmem:[%s4459_s3 + $0x260] sm:$0xff] %vm1708_vm0, %v1624_v33  ;;  %2234 = vst.msk [vmem:[%s4459_s3 + $0x7a0] sm:$0xff] %vm1708_vm0, %v1624_v33  ;;  %v666_v37 = vpop.permute.xlu1 %665  ;;  %v2118_v33 = vld [vmem:[%s4457_s1 + $0x30] ss:$0 sm:$0xff] }
 0x136   :  { %v661_v38 = vpop.permute.xlu0 %660  ;;  %v1627_v39 = vmul.f32 %v2109_v34, %v666_v37  ;;  %985 = vperm.xlu1 %2331, %v171_v35  }
 0x137   :  { %v1626_v40 = vmul.f32 %v2109_v34, %v661_v38  ;;  %980 = vperm.xlu0 %2330, %v170_v36   ;;  %v2119_v38 = vld [vmem:[%s4457_s1 + $0x31] ss:$0 sm:$0xff] }
 0x138   :  { %1788 = vst.msk [vmem:[%s4459_s3 + $0x278] sm:$0xff] %vm1708_vm0, %v1627_v39  ;;  %2237 = vst.msk [vmem:[%s4459_s3 + $0x7b8] sm:$0xff] %vm1708_vm0, %v1627_v39 }
 0x139   :  { %1787 = vst.msk [vmem:[%s4459_s3 + $0x270] sm:$0xff] %vm1708_vm0, %v1626_v40  ;;  %2236 = vst.msk [vmem:[%s4459_s3 + $0x7b0] sm:$0xff] %vm1708_vm0, %v1626_v40  ;;  %v676_v44 = vpop.permute.xlu1 %675 }
 0x13a   :  { %v671_v45 = vpop.permute.xlu0 %670  ;;  %v1629_v46 = vmul.f32 %v2110_v41, %v676_v44  ;;  %995 = vperm.xlu1 %2331, %v173_v42  }
 0x13b   :  { %v1628_v47 = vmul.f32 %v2110_v41, %v671_v45  ;;  %990 = vperm.xlu0 %2330, %v172_v43   ;;  %v2120_v43 = vld [vmem:[%s4457_s1 + $0x32] ss:$0 sm:$0xff] }
 0x13c   :  { %1790 = vst.msk [vmem:[%s4459_s3 + $0x288] sm:$0xff] %vm1708_vm0, %v1629_v46  ;;  %2239 = vst.msk [vmem:[%s4459_s3 + $0x7c8] sm:$0xff] %vm1708_vm0, %v1629_v46 }
 0x13d   :  { %1789 = vst.msk [vmem:[%s4459_s3 + $0x280] sm:$0xff] %vm1708_vm0, %v1628_v47  ;;  %2238 = vst.msk [vmem:[%s4459_s3 + $0x7c0] sm:$0xff] %vm1708_vm0, %v1628_v47  ;;  %v686_v51 = vpop.permute.xlu1 %685 }
 0x13e   :  { %v681_v52 = vpop.permute.xlu0 %680  ;;  %v1631_v53 = vmul.f32 %v2111_v48, %v686_v51  ;;  %1005 = vperm.xlu1 %2331, %v175_v49  }
 0x13f   :  { %v1630_v54 = vmul.f32 %v2111_v48, %v681_v52  ;;  %1000 = vperm.xlu0 %2330, %v174_v50   ;;  %v2121_v48 = vld [vmem:[%s4457_s1 + $0x33] ss:$0 sm:$0xff] }
 0x140   :  { %1792 = vst.msk [vmem:[%s4459_s3 + $0x298] sm:$0xff] %vm1708_vm0, %v1631_v53  ;;  %2241 = vst.msk [vmem:[%s4459_s3 + $0x7d8] sm:$0xff] %vm1708_vm0, %v1631_v53  ;;  %v2122_v53 = vld [vmem:[%s4457_s1 + $0x34] ss:$0 sm:$0xff] }
 0x141   :  { %1791 = vst.msk [vmem:[%s4459_s3 + $0x290] sm:$0xff] %vm1708_vm0, %v1630_v54  ;;  %2240 = vst.msk [vmem:[%s4459_s3 + $0x7d0] sm:$0xff] %vm1708_vm0, %v1630_v54  ;;  %v696_v58 = vpop.permute.xlu1 %695 }
 0x142   :  { %v691_v59 = vpop.permute.xlu0 %690  ;;  %v1633_v60 = vmul.f32 %v2112_v55, %v696_v58  ;;  %1015 = vperm.xlu1 %2331, %v177_v56   ;;  %v2123_v58 = vld [vmem:[%s4457_s1 + $0x35] ss:$0 sm:$0xff] }
 0x143   :  { %v1632_v61 = vmul.f32 %v2112_v55, %v691_v59  ;;  %1010 = vperm.xlu0 %2330, %v176_v57  }
 0x144   :  { %1794 = vst.msk [vmem:[%s4459_s3 + $0x2a8] sm:$0xff] %vm1708_vm0, %v1633_v60  ;;  %2243 = vst.msk [vmem:[%s4459_s3 + $0x7e8] sm:$0xff] %vm1708_vm0, %v1633_v60 }
 0x145   :  { %1793 = vst.msk [vmem:[%s4459_s3 + $0x2a0] sm:$0xff] %vm1708_vm0, %v1632_v61  ;;  %2242 = vst.msk [vmem:[%s4459_s3 + $0x7e0] sm:$0xff] %vm1708_vm0, %v1632_v61  ;;  %v706_v1 = vpop.permute.xlu1 %705 }
 0x146   :  { %v701_v2 = vpop.permute.xlu0 %700  ;;  %v1635_v3 = vmul.f32 %v2113_v62, %v706_v1  ;;  %1025 = vperm.xlu1 %2331, %v179_v63   ;;  %v2124_v63 = vld [vmem:[%s4457_s1 + $0x36] ss:$0 sm:$0xff] }
 0x147   :  { %v1634_v4 = vmul.f32 %v2113_v62, %v701_v2  ;;  %1020 = vperm.xlu0 %2330, %v178_v0  }
 0x148   :  { %1796 = vst.msk [vmem:[%s4459_s3 + $0x2b8] sm:$0xff] %vm1708_vm0, %v1635_v3  ;;  %2245 = vst.msk [vmem:[%s4459_s3 + $0x7f8] sm:$0xff] %vm1708_vm0, %v1635_v3 }
 0x149   :  { %1795 = vst.msk [vmem:[%s4459_s3 + $0x2b0] sm:$0xff] %vm1708_vm0, %v1634_v4  ;;  %2244 = vst.msk [vmem:[%s4459_s3 + $0x7f0] sm:$0xff] %vm1708_vm0, %v1634_v4  ;;  %v716_v8 = vpop.permute.xlu1 %715  ;;  %v2125_v4 = vld [vmem:[%s4457_s1 + $0x37] ss:$0 sm:$0xff] }
 0x14a   :  { %v711_v9 = vpop.permute.xlu0 %710  ;;  %v1637_v10 = vmul.f32 %v2114_v5, %v716_v8  ;;  %1035 = vperm.xlu1 %2331, %v181_v6  }
 0x14b   :  { %v1636_v11 = vmul.f32 %v2114_v5, %v711_v9  ;;  %1030 = vperm.xlu0 %2330, %v180_v7   ;;  %v2126_v9 = vld [vmem:[%s4457_s1 + $0x38] ss:$0 sm:$0xff] }
 0x14c   :  { %1798 = vst.msk [vmem:[%s4459_s3 + $0x2c8] sm:$0xff] %vm1708_vm0, %v1637_v10  ;;  %2247 = vst.msk [vmem:[%s4459_s3 + $0x808] sm:$0xff] %vm1708_vm0, %v1637_v10 }
 0x14d   :  { %1797 = vst.msk [vmem:[%s4459_s3 + $0x2c0] sm:$0xff] %vm1708_vm0, %v1636_v11  ;;  %2246 = vst.msk [vmem:[%s4459_s3 + $0x800] sm:$0xff] %vm1708_vm0, %v1636_v11  ;;  %v726_v15 = vpop.permute.xlu1 %725 }
 0x14e   :  { %v721_v16 = vpop.permute.xlu0 %720  ;;  %v1639_v17 = vmul.f32 %v2115_v12, %v726_v15  ;;  %1045 = vperm.xlu1 %2331, %v183_v13  }
 0x14f   :  { %v1638_v18 = vmul.f32 %v2115_v12, %v721_v16  ;;  %1040 = vperm.xlu0 %2330, %v182_v14   ;;  %v2127_v14 = vld [vmem:[%s4457_s1 + $0x39] ss:$0 sm:$0xff] }
 0x150   :  { %1800 = vst.msk [vmem:[%s4459_s3 + $0x2d8] sm:$0xff] %vm1708_vm0, %v1639_v17  ;;  %2249 = vst.msk [vmem:[%s4459_s3 + $0x818] sm:$0xff] %vm1708_vm0, %v1639_v17 }
 0x151   :  { %1799 = vst.msk [vmem:[%s4459_s3 + $0x2d0] sm:$0xff] %vm1708_vm0, %v1638_v18  ;;  %2248 = vst.msk [vmem:[%s4459_s3 + $0x810] sm:$0xff] %vm1708_vm0, %v1638_v18  ;;  %v736_v22 = vpop.permute.xlu1 %735 }
 0x152   :  { %v731_v23 = vpop.permute.xlu0 %730  ;;  %v1641_v24 = vmul.f32 %v2116_v19, %v736_v22  ;;  %1055 = vperm.xlu1 %2331, %v185_v20  }
 0x153   :  { %v1640_v25 = vmul.f32 %v2116_v19, %v731_v23  ;;  %1050 = vperm.xlu0 %2330, %v184_v21   ;;  %v2128_v19 = vld [vmem:[%s4457_s1 + $0x3a] ss:$0 sm:$0xff] }
 0x154   :  { %1802 = vst.msk [vmem:[%s4459_s3 + $0x2e8] sm:$0xff] %vm1708_vm0, %v1641_v24  ;;  %2251 = vst.msk [vmem:[%s4459_s3 + $0x828] sm:$0xff] %vm1708_vm0, %v1641_v24  ;;  %v2129_v24 = vld [vmem:[%s4457_s1 + $0x3b] ss:$0 sm:$0xff] }
 0x155   :  { %1801 = vst.msk [vmem:[%s4459_s3 + $0x2e0] sm:$0xff] %vm1708_vm0, %v1640_v25  ;;  %2250 = vst.msk [vmem:[%s4459_s3 + $0x820] sm:$0xff] %vm1708_vm0, %v1640_v25  ;;  %v746_v29 = vpop.permute.xlu1 %745 }
 0x156   :  { %v741_v30 = vpop.permute.xlu0 %740  ;;  %v1643_v31 = vmul.f32 %v2117_v26, %v746_v29  ;;  %1065 = vperm.xlu1 %2331, %v187_v27   ;;  %v2130_v29 = vld [vmem:[%s4457_s1 + $0x3c] ss:$0 sm:$0xff] }
 0x157   :  { %v1642_v32 = vmul.f32 %v2117_v26, %v741_v30  ;;  %1060 = vperm.xlu0 %2330, %v186_v28  }
 0x158   :  { %1804 = vst.msk [vmem:[%s4459_s3 + $0x2f8] sm:$0xff] %vm1708_vm0, %v1643_v31  ;;  %2253 = vst.msk [vmem:[%s4459_s3 + $0x838] sm:$0xff] %vm1708_vm0, %v1643_v31 }
 0x159   :  { %1803 = vst.msk [vmem:[%s4459_s3 + $0x2f0] sm:$0xff] %vm1708_vm0, %v1642_v32  ;;  %2252 = vst.msk [vmem:[%s4459_s3 + $0x830] sm:$0xff] %vm1708_vm0, %v1642_v32  ;;  %v756_v34 = vpop.permute.xlu1 %755 }
 0x15a   :  { %v751_v35 = vpop.permute.xlu0 %750  ;;  %v1645_v36 = vmul.f32 %v2118_v33, %v756_v34  ;;  %v2131_v34 = vld [vmem:[%s4457_s1 + $0x3d] ss:$0 sm:$0xff] }
 0x15b   :  { %v1644_v37 = vmul.f32 %v2118_v33, %v751_v35 }
 0x15c   :  { %1806 = vst.msk [vmem:[%s4459_s3 + $0x308] sm:$0xff] %vm1708_vm0, %v1645_v36  ;;  %2255 = vst.msk [vmem:[%s4459_s3 + $0x848] sm:$0xff] %vm1708_vm0, %v1645_v36 }
 0x15d   :  { %1805 = vst.msk [vmem:[%s4459_s3 + $0x300] sm:$0xff] %vm1708_vm0, %v1644_v37  ;;  %2254 = vst.msk [vmem:[%s4459_s3 + $0x840] sm:$0xff] %vm1708_vm0, %v1644_v37  ;;  %v766_v39 = vpop.permute.xlu1 %765 }
 0x15e   :  { %v761_v40 = vpop.permute.xlu0 %760  ;;  %v1647_v41 = vmul.f32 %v2119_v38, %v766_v39  ;;  %v2132_v39 = vld [vmem:[%s4457_s1 + $0x3e] ss:$0 sm:$0xff] }
 0x15f   :  { %v1646_v42 = vmul.f32 %v2119_v38, %v761_v40 }
 0x160   :  { %1808 = vst.msk [vmem:[%s4459_s3 + $0x318] sm:$0xff] %vm1708_vm0, %v1647_v41  ;;  %2257 = vst.msk [vmem:[%s4459_s3 + $0x858] sm:$0xff] %vm1708_vm0, %v1647_v41 }
 0x161   :  { %1807 = vst.msk [vmem:[%s4459_s3 + $0x310] sm:$0xff] %vm1708_vm0, %v1646_v42  ;;  %2256 = vst.msk [vmem:[%s4459_s3 + $0x850] sm:$0xff] %vm1708_vm0, %v1646_v42  ;;  %v776_v44 = vpop.permute.xlu1 %775 }
 0x162   :  { %v771_v45 = vpop.permute.xlu0 %770  ;;  %v1649_v46 = vmul.f32 %v2120_v43, %v776_v44  ;;  %v2133_v44 = vld [vmem:[%s4457_s1 + $0x3f] ss:$0 sm:$0xff] }
 0x163   :  { %v1648_v47 = vmul.f32 %v2120_v43, %v771_v45 }
 0x164   :  { %1810 = vst.msk [vmem:[%s4459_s3 + $0x328] sm:$0xff] %vm1708_vm0, %v1649_v46  ;;  %2259 = vst.msk [vmem:[%s4459_s3 + $0x868] sm:$0xff] %vm1708_vm0, %v1649_v46 }
 0x165   :  { %1809 = vst.msk [vmem:[%s4459_s3 + $0x320] sm:$0xff] %vm1708_vm0, %v1648_v47  ;;  %2258 = vst.msk [vmem:[%s4459_s3 + $0x860] sm:$0xff] %vm1708_vm0, %v1648_v47  ;;  %v786_v49 = vpop.permute.xlu1 %785 }
 0x166   :  { %v781_v50 = vpop.permute.xlu0 %780  ;;  %v1651_v51 = vmul.f32 %v2121_v48, %v786_v49  ;;  %v2134_v49 = vld [vmem:[%s4457_s1 + $0x40] ss:$0 sm:$0xff] }
 0x167   :  { %v1650_v52 = vmul.f32 %v2121_v48, %v781_v50 }
 0x168   :  { %1812 = vst.msk [vmem:[%s4459_s3 + $0x338] sm:$0xff] %vm1708_vm0, %v1651_v51  ;;  %2261 = vst.msk [vmem:[%s4459_s3 + $0x878] sm:$0xff] %vm1708_vm0, %v1651_v51 }
 0x169   :  { %1811 = vst.msk [vmem:[%s4459_s3 + $0x330] sm:$0xff] %vm1708_vm0, %v1650_v52  ;;  %2260 = vst.msk [vmem:[%s4459_s3 + $0x870] sm:$0xff] %vm1708_vm0, %v1650_v52  ;;  %v796_v54 = vpop.permute.xlu1 %795 }
 0x16a   :  { %v791_v55 = vpop.permute.xlu0 %790  ;;  %v1653_v56 = vmul.f32 %v2122_v53, %v796_v54  ;;  %v2135_v54 = vld [vmem:[%s4457_s1 + $0x41] ss:$0 sm:$0xff] }
 0x16b   :  { %v1652_v57 = vmul.f32 %v2122_v53, %v791_v55 }
 0x16c   :  { %1814 = vst.msk [vmem:[%s4459_s3 + $0x348] sm:$0xff] %vm1708_vm0, %v1653_v56  ;;  %2263 = vst.msk [vmem:[%s4459_s3 + $0x888] sm:$0xff] %vm1708_vm0, %v1653_v56 }
 0x16d   :  { %1813 = vst.msk [vmem:[%s4459_s3 + $0x340] sm:$0xff] %vm1708_vm0, %v1652_v57  ;;  %2262 = vst.msk [vmem:[%s4459_s3 + $0x880] sm:$0xff] %vm1708_vm0, %v1652_v57  ;;  %v806_v59 = vpop.permute.xlu1 %805 }
 0x16e   :  { %v801_v60 = vpop.permute.xlu0 %800  ;;  %v1655_v61 = vmul.f32 %v2123_v58, %v806_v59  ;;  %v2136_v59 = vld [vmem:[%s4457_s1 + $0x42] ss:$0 sm:$0xff] }
 0x16f   :  { %v1654_v62 = vmul.f32 %v2123_v58, %v801_v60 }
 0x170   :  { %1816 = vst.msk [vmem:[%s4459_s3 + $0x358] sm:$0xff] %vm1708_vm0, %v1655_v61  ;;  %2265 = vst.msk [vmem:[%s4459_s3 + $0x898] sm:$0xff] %vm1708_vm0, %v1655_v61 }
 0x171   :  { %1815 = vst.msk [vmem:[%s4459_s3 + $0x350] sm:$0xff] %vm1708_vm0, %v1654_v62  ;;  %2264 = vst.msk [vmem:[%s4459_s3 + $0x890] sm:$0xff] %vm1708_vm0, %v1654_v62  ;;  %v816_v0 = vpop.permute.xlu1 %815 }
 0x172   :  { %v811_v1 = vpop.permute.xlu0 %810  ;;  %v1657_v2 = vmul.f32 %v2124_v63, %v816_v0  ;;  %v2137_v0 = vld [vmem:[%s4457_s1 + $0x43] ss:$0 sm:$0xff] }
 0x173   :  { %v1656_v3 = vmul.f32 %v2124_v63, %v811_v1 }
 0x174   :  { %1818 = vst.msk [vmem:[%s4459_s3 + $0x368] sm:$0xff] %vm1708_vm0, %v1657_v2  ;;  %2267 = vst.msk [vmem:[%s4459_s3 + $0x8a8] sm:$0xff] %vm1708_vm0, %v1657_v2 }
 0x175   :  { %1817 = vst.msk [vmem:[%s4459_s3 + $0x360] sm:$0xff] %vm1708_vm0, %v1656_v3  ;;  %2266 = vst.msk [vmem:[%s4459_s3 + $0x8a0] sm:$0xff] %vm1708_vm0, %v1656_v3  ;;  %v826_v5 = vpop.permute.xlu1 %825 }
 0x176   :  { %v821_v6 = vpop.permute.xlu0 %820  ;;  %v1659_v7 = vmul.f32 %v2125_v4, %v826_v5  ;;  %v2138_v5 = vld [vmem:[%s4457_s1 + $0x44] ss:$0 sm:$0xff] }
 0x177   :  { %v1658_v8 = vmul.f32 %v2125_v4, %v821_v6 }
 0x178   :  { %1820 = vst.msk [vmem:[%s4459_s3 + $0x378] sm:$0xff] %vm1708_vm0, %v1659_v7  ;;  %2269 = vst.msk [vmem:[%s4459_s3 + $0x8b8] sm:$0xff] %vm1708_vm0, %v1659_v7 }
 0x179   :  { %1819 = vst.msk [vmem:[%s4459_s3 + $0x370] sm:$0xff] %vm1708_vm0, %v1658_v8  ;;  %2268 = vst.msk [vmem:[%s4459_s3 + $0x8b0] sm:$0xff] %vm1708_vm0, %v1658_v8  ;;  %v836_v10 = vpop.permute.xlu1 %835 }
 0x17a   :  { %v831_v11 = vpop.permute.xlu0 %830  ;;  %v1661_v12 = vmul.f32 %v2126_v9, %v836_v10  ;;  %v2139_v10 = vld [vmem:[%s4457_s1 + $0x45] ss:$0 sm:$0xff] }
 0x17b   :  { %v1660_v13 = vmul.f32 %v2126_v9, %v831_v11 }
 0x17c   :  { %1822 = vst.msk [vmem:[%s4459_s3 + $0x388] sm:$0xff] %vm1708_vm0, %v1661_v12  ;;  %2271 = vst.msk [vmem:[%s4459_s3 + $0x8c8] sm:$0xff] %vm1708_vm0, %v1661_v12 }
 0x17d   :  { %1821 = vst.msk [vmem:[%s4459_s3 + $0x380] sm:$0xff] %vm1708_vm0, %v1660_v13  ;;  %2270 = vst.msk [vmem:[%s4459_s3 + $0x8c0] sm:$0xff] %vm1708_vm0, %v1660_v13  ;;  %v846_v15 = vpop.permute.xlu1 %845 }
 0x17e   :  { %v841_v16 = vpop.permute.xlu0 %840  ;;  %v1663_v17 = vmul.f32 %v2127_v14, %v846_v15  ;;  %v2140_v15 = vld [vmem:[%s4457_s1 + $0x46] ss:$0 sm:$0xff] }
 0x17f   :  { %v1662_v18 = vmul.f32 %v2127_v14, %v841_v16 }
 0x180   :  { %1824 = vst.msk [vmem:[%s4459_s3 + $0x398] sm:$0xff] %vm1708_vm0, %v1663_v17  ;;  %2273 = vst.msk [vmem:[%s4459_s3 + $0x8d8] sm:$0xff] %vm1708_vm0, %v1663_v17 }
 0x181   :  { %1823 = vst.msk [vmem:[%s4459_s3 + $0x390] sm:$0xff] %vm1708_vm0, %v1662_v18  ;;  %2272 = vst.msk [vmem:[%s4459_s3 + $0x8d0] sm:$0xff] %vm1708_vm0, %v1662_v18  ;;  %v856_v20 = vpop.permute.xlu1 %855 }
 0x182   :  { %v851_v21 = vpop.permute.xlu0 %850  ;;  %v1665_v22 = vmul.f32 %v2128_v19, %v856_v20  ;;  %v2141_v20 = vld [vmem:[%s4457_s1 + $0x47] ss:$0 sm:$0xff] }
 0x183   :  { %v1664_v23 = vmul.f32 %v2128_v19, %v851_v21 }
 0x184   :  { %1826 = vst.msk [vmem:[%s4459_s3 + $0x3a8] sm:$0xff] %vm1708_vm0, %v1665_v22  ;;  %2275 = vst.msk [vmem:[%s4459_s3 + $0x8e8] sm:$0xff] %vm1708_vm0, %v1665_v22 }
 0x185   :  { %1825 = vst.msk [vmem:[%s4459_s3 + $0x3a0] sm:$0xff] %vm1708_vm0, %v1664_v23  ;;  %2274 = vst.msk [vmem:[%s4459_s3 + $0x8e0] sm:$0xff] %vm1708_vm0, %v1664_v23  ;;  %v866_v25 = vpop.permute.xlu1 %865 }
 0x186   :  { %v861_v26 = vpop.permute.xlu0 %860  ;;  %v1667_v27 = vmul.f32 %v2129_v24, %v866_v25  ;;  %v2142_v25 = vld [vmem:[%s4457_s1 + $0x48] ss:$0 sm:$0xff] }
 0x187   :  { %v1666_v28 = vmul.f32 %v2129_v24, %v861_v26 }
 0x188   :  { %1828 = vst.msk [vmem:[%s4459_s3 + $0x3b8] sm:$0xff] %vm1708_vm0, %v1667_v27  ;;  %2277 = vst.msk [vmem:[%s4459_s3 + $0x8f8] sm:$0xff] %vm1708_vm0, %v1667_v27 }
 0x189   :  { %1827 = vst.msk [vmem:[%s4459_s3 + $0x3b0] sm:$0xff] %vm1708_vm0, %v1666_v28  ;;  %2276 = vst.msk [vmem:[%s4459_s3 + $0x8f0] sm:$0xff] %vm1708_vm0, %v1666_v28  ;;  %v876_v30 = vpop.permute.xlu1 %875 }
 0x18a   :  { %v871_v31 = vpop.permute.xlu0 %870  ;;  %v1669_v32 = vmul.f32 %v2130_v29, %v876_v30  ;;  %v2143_v30 = vld [vmem:[%s4457_s1 + $0x49] ss:$0 sm:$0xff] }
 0x18b   :  { %v1668_v33 = vmul.f32 %v2130_v29, %v871_v31 }
 0x18c   :  { %1830 = vst.msk [vmem:[%s4459_s3 + $0x3c8] sm:$0xff] %vm1708_vm0, %v1669_v32  ;;  %2279 = vst.msk [vmem:[%s4459_s3 + $0x908] sm:$0xff] %vm1708_vm0, %v1669_v32 }
 0x18d   :  { %1829 = vst.msk [vmem:[%s4459_s3 + $0x3c0] sm:$0xff] %vm1708_vm0, %v1668_v33  ;;  %2278 = vst.msk [vmem:[%s4459_s3 + $0x900] sm:$0xff] %vm1708_vm0, %v1668_v33  ;;  %v886_v35 = vpop.permute.xlu1 %885 }
 0x18e   :  { %v881_v36 = vpop.permute.xlu0 %880  ;;  %v1671_v37 = vmul.f32 %v2131_v34, %v886_v35  ;;  %v2144_v35 = vld [vmem:[%s4457_s1 + $0x4a] ss:$0 sm:$0xff] }
 0x18f   :  { %v1670_v38 = vmul.f32 %v2131_v34, %v881_v36 }
 0x190   :  { %1832 = vst.msk [vmem:[%s4459_s3 + $0x3d8] sm:$0xff] %vm1708_vm0, %v1671_v37  ;;  %2281 = vst.msk [vmem:[%s4459_s3 + $0x918] sm:$0xff] %vm1708_vm0, %v1671_v37 }
 0x191   :  { %1831 = vst.msk [vmem:[%s4459_s3 + $0x3d0] sm:$0xff] %vm1708_vm0, %v1670_v38  ;;  %2280 = vst.msk [vmem:[%s4459_s3 + $0x910] sm:$0xff] %vm1708_vm0, %v1670_v38  ;;  %v896_v40 = vpop.permute.xlu1 %895 }
 0x192   :  { %v891_v41 = vpop.permute.xlu0 %890  ;;  %v1673_v42 = vmul.f32 %v2132_v39, %v896_v40  ;;  %v2145_v40 = vld [vmem:[%s4457_s1 + $0x4b] ss:$0 sm:$0xff] }
 0x193   :  { %v1672_v43 = vmul.f32 %v2132_v39, %v891_v41 }
 0x194   :  { %1834 = vst.msk [vmem:[%s4459_s3 + $0x3e8] sm:$0xff] %vm1708_vm0, %v1673_v42  ;;  %2283 = vst.msk [vmem:[%s4459_s3 + $0x928] sm:$0xff] %vm1708_vm0, %v1673_v42 }
 0x195   :  { %1833 = vst.msk [vmem:[%s4459_s3 + $0x3e0] sm:$0xff] %vm1708_vm0, %v1672_v43  ;;  %2282 = vst.msk [vmem:[%s4459_s3 + $0x920] sm:$0xff] %vm1708_vm0, %v1672_v43  ;;  %v906_v45 = vpop.permute.xlu1 %905 }
 0x196   :  { %v901_v46 = vpop.permute.xlu0 %900  ;;  %v1675_v47 = vmul.f32 %v2133_v44, %v906_v45  ;;  %v2146_v45 = vld [vmem:[%s4457_s1 + $0x4c] ss:$0 sm:$0xff] }
 0x197   :  { %v1674_v48 = vmul.f32 %v2133_v44, %v901_v46 }
 0x198   :  { %1836 = vst.msk [vmem:[%s4459_s3 + $0x3f8] sm:$0xff] %vm1708_vm0, %v1675_v47  ;;  %2285 = vst.msk [vmem:[%s4459_s3 + $0x938] sm:$0xff] %vm1708_vm0, %v1675_v47 }
 0x199   :  { %1835 = vst.msk [vmem:[%s4459_s3 + $0x3f0] sm:$0xff] %vm1708_vm0, %v1674_v48  ;;  %2284 = vst.msk [vmem:[%s4459_s3 + $0x930] sm:$0xff] %vm1708_vm0, %v1674_v48  ;;  %v916_v50 = vpop.permute.xlu1 %915 }
 0x19a   :  { %v911_v51 = vpop.permute.xlu0 %910  ;;  %v1677_v52 = vmul.f32 %v2134_v49, %v916_v50  ;;  %v2147_v50 = vld [vmem:[%s4457_s1 + $0x4d] ss:$0 sm:$0xff] }
 0x19b   :  { %v1676_v53 = vmul.f32 %v2134_v49, %v911_v51 }
 0x19c   :  { %1838 = vst.msk [vmem:[%s4459_s3 + $0x408] sm:$0xff] %vm1708_vm0, %v1677_v52  ;;  %2287 = vst.msk [vmem:[%s4459_s3 + $0x948] sm:$0xff] %vm1708_vm0, %v1677_v52 }
 0x19d   :  { %1837 = vst.msk [vmem:[%s4459_s3 + $0x400] sm:$0xff] %vm1708_vm0, %v1676_v53  ;;  %2286 = vst.msk [vmem:[%s4459_s3 + $0x940] sm:$0xff] %vm1708_vm0, %v1676_v53  ;;  %v926_v55 = vpop.permute.xlu1 %925 }
 0x19e   :  { %v921_v56 = vpop.permute.xlu0 %920  ;;  %v1679_v57 = vmul.f32 %v2135_v54, %v926_v55  ;;  %v2148_v55 = vld [vmem:[%s4457_s1 + $0x4e] ss:$0 sm:$0xff] }
 0x19f   :  { %v1678_v58 = vmul.f32 %v2135_v54, %v921_v56 }
 0x1a0   :  { %1840 = vst.msk [vmem:[%s4459_s3 + $0x418] sm:$0xff] %vm1708_vm0, %v1679_v57  ;;  %2289 = vst.msk [vmem:[%s4459_s3 + $0x958] sm:$0xff] %vm1708_vm0, %v1679_v57 }
 0x1a1   :  { %1839 = vst.msk [vmem:[%s4459_s3 + $0x410] sm:$0xff] %vm1708_vm0, %v1678_v58  ;;  %2288 = vst.msk [vmem:[%s4459_s3 + $0x950] sm:$0xff] %vm1708_vm0, %v1678_v58  ;;  %v936_v60 = vpop.permute.xlu1 %935 }
 0x1a2   :  { %v931_v61 = vpop.permute.xlu0 %930  ;;  %v1681_v62 = vmul.f32 %v2136_v59, %v936_v60  ;;  %v2149_v60 = vld [vmem:[%s4457_s1 + $0x4f] ss:$0 sm:$0xff] }
 0x1a3   :  { %v1680_v63 = vmul.f32 %v2136_v59, %v931_v61 }
 0x1a4   :  { %1842 = vst.msk [vmem:[%s4459_s3 + $0x428] sm:$0xff] %vm1708_vm0, %v1681_v62  ;;  %2291 = vst.msk [vmem:[%s4459_s3 + $0x968] sm:$0xff] %vm1708_vm0, %v1681_v62 }
 0x1a5   :  { %1841 = vst.msk [vmem:[%s4459_s3 + $0x420] sm:$0xff] %vm1708_vm0, %v1680_v63  ;;  %2290 = vst.msk [vmem:[%s4459_s3 + $0x960] sm:$0xff] %vm1708_vm0, %v1680_v63  ;;  %v946_v1 = vpop.permute.xlu1 %945 }
 0x1a6   :  { %v941_v2 = vpop.permute.xlu0 %940  ;;  %v1683_v3 = vmul.f32 %v2137_v0, %v946_v1 }
 0x1a7   :  { %v1682_v4 = vmul.f32 %v2137_v0, %v941_v2 }
 0x1a8   :  { %1844 = vst.msk [vmem:[%s4459_s3 + $0x438] sm:$0xff] %vm1708_vm0, %v1683_v3  ;;  %2293 = vst.msk [vmem:[%s4459_s3 + $0x978] sm:$0xff] %vm1708_vm0, %v1683_v3 }
 0x1a9   :  { %1843 = vst.msk [vmem:[%s4459_s3 + $0x430] sm:$0xff] %vm1708_vm0, %v1682_v4  ;;  %2292 = vst.msk [vmem:[%s4459_s3 + $0x970] sm:$0xff] %vm1708_vm0, %v1682_v4  ;;  %v956_v6 = vpop.permute.xlu1 %955 }
 0x1aa   :  { %v951_v7 = vpop.permute.xlu0 %950  ;;  %v1685_v8 = vmul.f32 %v2138_v5, %v956_v6 }
 0x1ab   :  { %v1684_v9 = vmul.f32 %v2138_v5, %v951_v7 }
 0x1ac   :  { %1846 = vst.msk [vmem:[%s4459_s3 + $0x448] sm:$0xff] %vm1708_vm0, %v1685_v8  ;;  %2295 = vst.msk [vmem:[%s4459_s3 + $0x988] sm:$0xff] %vm1708_vm0, %v1685_v8 }
 0x1ad   :  { %1845 = vst.msk [vmem:[%s4459_s3 + $0x440] sm:$0xff] %vm1708_vm0, %v1684_v9  ;;  %2294 = vst.msk [vmem:[%s4459_s3 + $0x980] sm:$0xff] %vm1708_vm0, %v1684_v9  ;;  %v966_v11 = vpop.permute.xlu1 %965 }
 0x1ae   :  { %v961_v12 = vpop.permute.xlu0 %960  ;;  %v1687_v13 = vmul.f32 %v2139_v10, %v966_v11 }
 0x1af   :  { %v1686_v14 = vmul.f32 %v2139_v10, %v961_v12 }
 0x1b0   :  { %1848 = vst.msk [vmem:[%s4459_s3 + $0x458] sm:$0xff] %vm1708_vm0, %v1687_v13  ;;  %2297 = vst.msk [vmem:[%s4459_s3 + $0x998] sm:$0xff] %vm1708_vm0, %v1687_v13 }
 0x1b1   :  { %1847 = vst.msk [vmem:[%s4459_s3 + $0x450] sm:$0xff] %vm1708_vm0, %v1686_v14  ;;  %2296 = vst.msk [vmem:[%s4459_s3 + $0x990] sm:$0xff] %vm1708_vm0, %v1686_v14  ;;  %v976_v16 = vpop.permute.xlu1 %975 }
 0x1b2   :  { %v971_v17 = vpop.permute.xlu0 %970  ;;  %v1689_v18 = vmul.f32 %v2140_v15, %v976_v16 }
 0x1b3   :  { %v1688_v19 = vmul.f32 %v2140_v15, %v971_v17 }
 0x1b4   :  { %1850 = vst.msk [vmem:[%s4459_s3 + $0x468] sm:$0xff] %vm1708_vm0, %v1689_v18  ;;  %2299 = vst.msk [vmem:[%s4459_s3 + $0x9a8] sm:$0xff] %vm1708_vm0, %v1689_v18 }
 0x1b5   :  { %1849 = vst.msk [vmem:[%s4459_s3 + $0x460] sm:$0xff] %vm1708_vm0, %v1688_v19  ;;  %2298 = vst.msk [vmem:[%s4459_s3 + $0x9a0] sm:$0xff] %vm1708_vm0, %v1688_v19  ;;  %v986_v21 = vpop.permute.xlu1 %985 }
 0x1b6   :  { %v981_v22 = vpop.permute.xlu0 %980  ;;  %v1691_v23 = vmul.f32 %v2141_v20, %v986_v21 }
 0x1b7   :  { %v1690_v24 = vmul.f32 %v2141_v20, %v981_v22 }
 0x1b8   :  { %1852 = vst.msk [vmem:[%s4459_s3 + $0x478] sm:$0xff] %vm1708_vm0, %v1691_v23  ;;  %2301 = vst.msk [vmem:[%s4459_s3 + $0x9b8] sm:$0xff] %vm1708_vm0, %v1691_v23 }
 0x1b9   :  { %1851 = vst.msk [vmem:[%s4459_s3 + $0x470] sm:$0xff] %vm1708_vm0, %v1690_v24  ;;  %2300 = vst.msk [vmem:[%s4459_s3 + $0x9b0] sm:$0xff] %vm1708_vm0, %v1690_v24  ;;  %v996_v26 = vpop.permute.xlu1 %995 }
 0x1ba   :  { %v991_v27 = vpop.permute.xlu0 %990  ;;  %v1693_v28 = vmul.f32 %v2142_v25, %v996_v26 }
 0x1bb   :  { %v1692_v29 = vmul.f32 %v2142_v25, %v991_v27 }
 0x1bc   :  { %1854 = vst.msk [vmem:[%s4459_s3 + $0x488] sm:$0xff] %vm1708_vm0, %v1693_v28  ;;  %2303 = vst.msk [vmem:[%s4459_s3 + $0x9c8] sm:$0xff] %vm1708_vm0, %v1693_v28 }
 0x1bd   :  { %1853 = vst.msk [vmem:[%s4459_s3 + $0x480] sm:$0xff] %vm1708_vm0, %v1692_v29  ;;  %2302 = vst.msk [vmem:[%s4459_s3 + $0x9c0] sm:$0xff] %vm1708_vm0, %v1692_v29  ;;  %v1006_v31 = vpop.permute.xlu1 %1005 }
 0x1be   :  { %v1001_v32 = vpop.permute.xlu0 %1000  ;;  %v1695_v33 = vmul.f32 %v2143_v30, %v1006_v31 }
 0x1bf   :  { %v1694_v34 = vmul.f32 %v2143_v30, %v1001_v32 }
 0x1c0   :  { %1856 = vst.msk [vmem:[%s4459_s3 + $0x498] sm:$0xff] %vm1708_vm0, %v1695_v33  ;;  %2305 = vst.msk [vmem:[%s4459_s3 + $0x9d8] sm:$0xff] %vm1708_vm0, %v1695_v33 }
 0x1c1   :  { %1855 = vst.msk [vmem:[%s4459_s3 + $0x490] sm:$0xff] %vm1708_vm0, %v1694_v34  ;;  %2304 = vst.msk [vmem:[%s4459_s3 + $0x9d0] sm:$0xff] %vm1708_vm0, %v1694_v34  ;;  %v1016_v36 = vpop.permute.xlu1 %1015 }
 0x1c2   :  { %v1011_v37 = vpop.permute.xlu0 %1010  ;;  %v1697_v38 = vmul.f32 %v2144_v35, %v1016_v36 }
 0x1c3   :  { %v1696_v39 = vmul.f32 %v2144_v35, %v1011_v37 }
 0x1c4   :  { %1858 = vst.msk [vmem:[%s4459_s3 + $0x4a8] sm:$0xff] %vm1708_vm0, %v1697_v38  ;;  %2307 = vst.msk [vmem:[%s4459_s3 + $0x9e8] sm:$0xff] %vm1708_vm0, %v1697_v38 }
 0x1c5   :  { %1857 = vst.msk [vmem:[%s4459_s3 + $0x4a0] sm:$0xff] %vm1708_vm0, %v1696_v39  ;;  %2306 = vst.msk [vmem:[%s4459_s3 + $0x9e0] sm:$0xff] %vm1708_vm0, %v1696_v39  ;;  %v1026_v41 = vpop.permute.xlu1 %1025 }
 0x1c6   :  { %v1021_v42 = vpop.permute.xlu0 %1020  ;;  %v1699_v43 = vmul.f32 %v2145_v40, %v1026_v41 }
 0x1c7   :  { %v1698_v44 = vmul.f32 %v2145_v40, %v1021_v42 }
 0x1c8   :  { %1860 = vst.msk [vmem:[%s4459_s3 + $0x4b8] sm:$0xff] %vm1708_vm0, %v1699_v43  ;;  %2309 = vst.msk [vmem:[%s4459_s3 + $0x9f8] sm:$0xff] %vm1708_vm0, %v1699_v43 }
 0x1c9   :  { %1859 = vst.msk [vmem:[%s4459_s3 + $0x4b0] sm:$0xff] %vm1708_vm0, %v1698_v44  ;;  %2308 = vst.msk [vmem:[%s4459_s3 + $0x9f0] sm:$0xff] %vm1708_vm0, %v1698_v44  ;;  %v1036_v46 = vpop.permute.xlu1 %1035 }
 0x1ca   :  { %v1031_v47 = vpop.permute.xlu0 %1030  ;;  %v1701_v48 = vmul.f32 %v2146_v45, %v1036_v46 }
 0x1cb   :  { %v1700_v49 = vmul.f32 %v2146_v45, %v1031_v47 }
 0x1cc   :  { %1862 = vst.msk [vmem:[%s4459_s3 + $0x4c8] sm:$0xff] %vm1708_vm0, %v1701_v48  ;;  %2311 = vst.msk [vmem:[%s4459_s3 + $0xa08] sm:$0xff] %vm1708_vm0, %v1701_v48 }
 0x1cd   :  { %1861 = vst.msk [vmem:[%s4459_s3 + $0x4c0] sm:$0xff] %vm1708_vm0, %v1700_v49  ;;  %2310 = vst.msk [vmem:[%s4459_s3 + $0xa00] sm:$0xff] %vm1708_vm0, %v1700_v49  ;;  %v1046_v51 = vpop.permute.xlu1 %1045 }
 0x1ce   :  { %v1041_v52 = vpop.permute.xlu0 %1040  ;;  %v1703_v53 = vmul.f32 %v2147_v50, %v1046_v51 }
 0x1cf   :  { %v1702_v54 = vmul.f32 %v2147_v50, %v1041_v52 }
 0x1d0   :  { %1864 = vst.msk [vmem:[%s4459_s3 + $0x4d8] sm:$0xff] %vm1708_vm0, %v1703_v53  ;;  %2313 = vst.msk [vmem:[%s4459_s3 + $0xa18] sm:$0xff] %vm1708_vm0, %v1703_v53 }
 0x1d1   :  { %1863 = vst.msk [vmem:[%s4459_s3 + $0x4d0] sm:$0xff] %vm1708_vm0, %v1702_v54  ;;  %2312 = vst.msk [vmem:[%s4459_s3 + $0xa10] sm:$0xff] %vm1708_vm0, %v1702_v54  ;;  %v1056_v56 = vpop.permute.xlu1 %1055 }
 0x1d2   :  { %v1051_v57 = vpop.permute.xlu0 %1050  ;;  %v1705_v58 = vmul.f32 %v2148_v55, %v1056_v56 }
 0x1d3   :  { %v1704_v59 = vmul.f32 %v2148_v55, %v1051_v57 }
 0x1d4   :  { %1866 = vst.msk [vmem:[%s4459_s3 + $0x4e8] sm:$0xff] %vm1708_vm0, %v1705_v58  ;;  %2315 = vst.msk [vmem:[%s4459_s3 + $0xa28] sm:$0xff] %vm1708_vm0, %v1705_v58 }
 0x1d5   :  { %1865 = vst.msk [vmem:[%s4459_s3 + $0x4e0] sm:$0xff] %vm1708_vm0, %v1704_v59  ;;  %2314 = vst.msk [vmem:[%s4459_s3 + $0xa20] sm:$0xff] %vm1708_vm0, %v1704_v59  ;;  %v1066_v61 = vpop.permute.xlu1 %1065 }
 0x1d6   :  { %v1061_v62 = vpop.permute.xlu0 %1060  ;;  %v1707_v63 = vmul.f32 %v2149_v60, %v1066_v61 }
 0x1d7   :  { %v1706_v0 = vmul.f32 %v2149_v60, %v1061_v62 }
 0x1d8   :  { %1868 = vst.msk [vmem:[%s4459_s3 + $0x4f8] sm:$0xff] %vm1708_vm0, %v1707_v63  ;;  %2317 = vst.msk [vmem:[%s4459_s3 + $0xa38] sm:$0xff] %vm1708_vm0, %v1707_v63 }
 0x1d9   :  { %1867 = vst.msk [vmem:[%s4459_s3 + $0x4f0] sm:$0xff] %vm1708_vm0, %v1706_v0  ;;  %2316 = vst.msk [vmem:[%s4459_s3 + $0xa30] sm:$0xff] %vm1708_vm0, %v1706_v0 }
 0x1da   :  { %2069 = vsyncpa [#allocation3], 1 }

</bundles_post_ra>
